<compile_context>
chip_gen: v7x
topology: tpu7x:2x2x1
jax: 0.10.0
libtpu: 0.0.40
codegen_flags: <defaults>
</compile_context>

<pallas_src>
import numpy as np
import jax
import jax.numpy as jnp
from jax.experimental import pallas as pl
from jax.experimental.pallas import tpu as pltpu

BN_EPS = 1e-5

# Static geometry of the tiny VGG16: (H, W, Cin, Cout, pool) per conv stage.
_STAGES = ((16, 16, 3, 4, 1), (16, 16, 4, 4, 4), (4, 4, 4, 8, 2), (2, 2, 8, 8, 2))


# ---------------------------------------------------------------------------
# Fused kernel
# ---------------------------------------------------------------------------
def make_vgg_kernel(N):
    def shift_down(x):
        # out[r] = x[r-1]; out[0] wraps to x[L-1] (always masked by the caller).
        L = x.shape[0]
        return jnp.concatenate([x[L - 1:L, :], x[0:L - 1, :]], axis=0)

    def shift_up(x):
        # out[r] = x[r+1]; out[L-1] wraps to x[0] (always masked by the caller).
        L = x.shape[0]
        return jnp.concatenate([x[1:L, :], x[0:1, :]], axis=0)

    def conv_stage(act, tcat, scale, bias, H):
        """3x3 conv + folded BN + ReLU on the whole [N*H, W*Cin] row slab.

        Single MXU dot per stage: the three vertical taps are K-concatenated
        in `tcat` ([3*W*Cin, W*Cout]); the LHS lane-concatenates the slab with
        its row-shifted copies.  An iota row mask zeroes contributions that
        would cross a sample / image boundary (replaces padded pad-rows).
        """
        L, WC = act.shape
        rows = jax.lax.broadcasted_iota(jnp.int32, (L, WC), 0)
        up = jnp.where((rows % H) != 0, shift_down(act), 0.0)       # in[h-1]
        dn = jnp.where((rows % H) != (H - 1), shift_up(act), 0.0)   # in[h+1]
        lhs = jnp.concatenate([up, act, dn], axis=1)                # [L, 3*WC]
        acc = jnp.dot(lhs, tcat, preferred_element_type=jnp.float32)
        # Folded-BN scale/bias + ReLU once on the whole [N*H, W*Cout] block.
        return jnp.maximum(acc * scale + bias, 0.0)

    def maxpool(y, H, W, C, p):
        """p x p max-pool of y [N*H, W*C] -> [N*H//p, (W//p)*C] (value ops only)."""
        L = N * H
        # H-pool: cross-sublane max of each p-row block.
        hrows = [jnp.max(y[k * p:(k + 1) * p, :], axis=0, keepdims=True)
                 for k in range(L // p)]
        hm = hrows[0] if len(hrows) == 1 else jnp.concatenate(hrows, axis=0)
        # W-pool: max over p adjacent channel blocks along the lane axis.
        Wo = W // p
        blocks = []
        for wo in range(Wo):
            m = hm[:, (wo * p) * C:(wo * p) * C + C]
            for j in range(1, p):
                m = jnp.maximum(m, hm[:, (wo * p + j) * C:(wo * p + j) * C + C])
            blocks.append(m)
        return blocks[0] if Wo == 1 else jnp.concatenate(blocks, axis=1)

    def kernel(x_ref,
               t1_ref, s1_ref, b1_ref,
               t2_ref, s2_ref, b2_ref,
               t3_ref, s3_ref, b3_ref,
               t4_ref, s4_ref, b4_ref,
               fcw_ref, fcb_ref,
               o_ref):
        # ----- stage 1: conv 3->4 @ 16x16 (no pool) -----
        y1 = conv_stage(x_ref[...], t1_ref[...], s1_ref[...], b1_ref[...], H=16)
        # ----- stage 2: conv 4->4 @ 16x16, maxpool 4 -----
        y2 = conv_stage(y1, t2_ref[...], s2_ref[...], b2_ref[...], H=16)
        a3 = maxpool(y2, H=16, W=16, C=4, p=4)          # [N*4, 16]
        # ----- stage 3: conv 4->8 @ 4x4, maxpool 2 -----
        y3 = conv_stage(a3, t3_ref[...], s3_ref[...], b3_ref[...], H=4)
        a4 = maxpool(y3, H=4, W=4, C=8, p=2)            # [N*2, 16]
        # ----- stage 4: conv 8->8 @ 2x2, maxpool 2 -----
        y4 = conv_stage(a4, t4_ref[...], s4_ref[...], b4_ref[...], H=2)
        feat = maxpool(y4, H=2, W=2, C=8, p=2)          # [N, 8]
        # ----- Flatten + Linear(8, 1) + Sigmoid (VPU mul + XLU lane-sum) -----
        z = jnp.sum(feat * fcw_ref[...], axis=1, keepdims=True) + fcb_ref[...]
        o_ref[...] = 1.0 / (1.0 + jnp.exp(-z))

    return kernel


# ---------------------------------------------------------------------------
# Wrapper-side packing: K-concatenated tap matrices + folded BN scale/bias.
# ---------------------------------------------------------------------------
def conv_tap_matrices(w, Wsp):
    """w: [Cout, Cin, 3, 3] -> T_cat: [3*Wsp*Cin, Wsp*Cout].

    Rows are the K-concatenation over the vertical tap dy of
    T[dy][(wi*Cin + ci), (wo*Cout + co)] = w[co, ci, dy, dx] with wi = wo+dx-1,
    dx in {0,1,2}, 0 <= wi < Wsp (horizontal zero padding folded in)."""
    Cout, Cin = w.shape[0], w.shape[1]
    sel = np.zeros((3, Wsp, Wsp), np.float32)
    for dx in range(3):
        for wo in range(Wsp):
            wi = wo + dx - 1
            if 0 <= wi < Wsp:
                sel[dx, wi, wo] = 1.0
    # t6[dy, wi, ci, wo, co] = sum_dx sel[dx, wi, wo] * w[co, ci, dy, dx]
    t6 = jnp.einsum('xiw,ocyx->yicwo', jnp.asarray(sel), w)
    return t6.reshape(3 * Wsp * Cin, Wsp * Cout)


def vgg16_forward(x_nchw, params, fc_w, fc_b):
    N, _, H0, W0 = x_nchw.shape
    # NCHW -> NHWC -> unpadded lane-dense row slab [N*H, W*Cin]
    x_rows = jnp.transpose(x_nchw, (0, 2, 3, 1)).astype(jnp.float32)
    x_rows = x_rows.reshape(N * H0, W0 * 3)

    inputs = [x_rows]
    for p, (H, Wsp, cin, cout, pool) in zip(params, _STAGES):
        Tcat = conv_tap_matrices(p["w"].astype(jnp.float32), Wsp)
        scale_c = p["gamma"] / jnp.sqrt(p["var"] + BN_EPS)
        bias_c = (p["b"] - p["mean"]) * scale_c + p["beta"]
        inputs += [Tcat,
                   jnp.tile(scale_c, (Wsp,)).reshape(1, Wsp * cout),
                   jnp.tile(bias_c, (Wsp,)).reshape(1, Wsp * cout)]
    inputs += [fc_w.reshape(1, 8).astype(jnp.float32),   # lane-broadcast weight row
               fc_b.reshape(1, 1).astype(jnp.float32)]

    vmem = pl.BlockSpec(memory_space=pltpu.MemorySpace.VMEM)
    return pl.pallas_call(
        make_vgg_kernel(N),
        out_shape=jax.ShapeDtypeStruct((N, 1), jnp.float32),
        in_specs=[vmem] * len(inputs),
        out_specs=vmem,
    )(*inputs)


# ---------------------------------------------------------------------------
# Parameters (deterministic, synthetic) and pure-JAX reference.
# ---------------------------------------------------------------------------
def init_params(key):
    stage_defs = [(3, 4, 1), (4, 4, 4), (4, 8, 2), (8, 8, 2)]  # (Cin, Cout, pool)
    params = []
    for cin, cout, pool in stage_defs:
        key, k1, k2, k3, k4, k5, k6 = jax.random.split(key, 7)
        params.append(dict(
            w=0.2 * jax.random.normal(k1, (cout, cin, 3, 3), jnp.float32),
            b=0.1 * jax.random.normal(k2, (cout,), jnp.float32),
            gamma=1.0 + 0.1 * jax.random.normal(k3, (cout,), jnp.float32),
            beta=0.1 * jax.random.normal(k4, (cout,), jnp.float32),
            mean=0.1 * jax.random.normal(k5, (cout,), jnp.float32),
            var=1.0 + 0.1 * jnp.abs(jax.random.normal(k6, (cout,), jnp.float32)),
            pool=pool,
        ))
    key, kw, kb = jax.random.split(key, 3)
    fc_w = 0.2 * jax.random.normal(kw, (1, 8), jnp.float32)
    fc_b = 0.1 * jax.random.normal(kb, (1,), jnp.float32)
    return params, fc_w, fc_b


def reference_forward(x_nchw, params, fc_w, fc_b):
    y = x_nchw
    for p in params:
        c = p["w"].shape[0]
        y = jax.lax.conv_general_dilated(
            y, p["w"], window_strides=(1, 1), padding=((1, 1), (1, 1)),
            dimension_numbers=("NCHW", "OIHW", "NCHW"),
            precision=jax.lax.Precision.HIGHEST)
        y = y + p["b"].reshape(1, c, 1, 1)
        y = (y - p["mean"].reshape(1, c, 1, 1)) / jnp.sqrt(
            p["var"].reshape(1, c, 1, 1) + BN_EPS)
        y = y * p["gamma"].reshape(1, c, 1, 1) + p["beta"].reshape(1, c, 1, 1)
        y = jnp.maximum(y, 0.0)
        if p["pool"] > 1:
            pp = p["pool"]
            Nn, C, H, W = y.shape
            y = y.reshape(Nn, C, H // pp, pp, W // pp, pp).max(axis=(3, 5))
    yf = y.reshape(y.shape[0], -1)
    z = jnp.sum(yf * fc_w, axis=1, keepdims=True) + fc_b
    return jax.nn.sigmoid(z)


if __name__ == "__main__":
    key = jax.random.PRNGKey(0)
    key, kx = jax.random.split(key)
    # Input spatial size must be 16x16 so Flatten yields 8 features for Linear(8, 1).
    x = jax.random.normal(kx, (2, 3, 16, 16), jnp.float32)
    params, fc_w, fc_b = init_params(key)

    out = jax.block_until_ready(jax.jit(vgg16_forward)(x, params, fc_w, fc_b))
    ref = reference_forward(x, params, fc_w, fc_b)

    assert out.shape == (2, 1) and out.dtype == jnp.float32
    # Tolerance covers MXU f32-dot pass decomposition vs the HIGHEST-precision
    # XLA reference; real layout/indexing bugs produce O(1e-1) differences.
    np.testing.assert_allclose(np.asarray(out), np.asarray(ref), atol=5e-3, rtol=5e-3)
    print("KERNEL_OK")
</pallas_src>

<mosaic_0001>
module attributes {stable_mosaic.version = 11 : i64} {
  func.func @kernel(%arg0: memref<32x48xf32, #tpu.memory_space<vmem>>, %arg1: memref<144x64xf32, #tpu.memory_space<vmem>>, %arg2: memref<1x64xf32, #tpu.memory_space<vmem>>, %arg3: memref<1x64xf32, #tpu.memory_space<vmem>>, %arg4: memref<192x64xf32, #tpu.memory_space<vmem>>, %arg5: memref<1x64xf32, #tpu.memory_space<vmem>>, %arg6: memref<1x64xf32, #tpu.memory_space<vmem>>, %arg7: memref<48x32xf32, #tpu.memory_space<vmem>>, %arg8: memref<1x32xf32, #tpu.memory_space<vmem>>, %arg9: memref<1x32xf32, #tpu.memory_space<vmem>>, %arg10: memref<48x16xf32, #tpu.memory_space<vmem>>, %arg11: memref<1x16xf32, #tpu.memory_space<vmem>>, %arg12: memref<1x16xf32, #tpu.memory_space<vmem>>, %arg13: memref<1x8xf32, #tpu.memory_space<vmem>>, %arg14: memref<1x1xf32, #tpu.memory_space<vmem>>, %arg15: memref<2x1xf32, #tpu.memory_space<vmem>>) attributes {dimension_semantics = [], scalar_prefetch = 0 : i64, scratch_operands = 0 : i64, tpu.core_type = #tpu.core_type<tc>} {
    %c0 = arith.constant 0 : index
    %c0_0 = arith.constant 0 : index
    %0 = vector.load %arg0[%c0, %c0_0] : memref<32x48xf32, #tpu.memory_space<vmem>>, vector<32x48xf32>
    %c0_1 = arith.constant 0 : index
    %c0_2 = arith.constant 0 : index
    %1 = vector.load %arg1[%c0_1, %c0_2] : memref<144x64xf32, #tpu.memory_space<vmem>>, vector<144x64xf32>
    %c0_3 = arith.constant 0 : index
    %c0_4 = arith.constant 0 : index
    %2 = vector.load %arg2[%c0_3, %c0_4] : memref<1x64xf32, #tpu.memory_space<vmem>>, vector<1x64xf32>
    %c0_5 = arith.constant 0 : index
    %c0_6 = arith.constant 0 : index
    %3 = vector.load %arg3[%c0_5, %c0_6] : memref<1x64xf32, #tpu.memory_space<vmem>>, vector<1x64xf32>
    %4 = tpu.iota {dimensions = array<i32: 0>} : vector<32x48xi32>
    %c16_i32 = arith.constant 16 : i32
    %c0_i32 = arith.constant 0 : i32
    %5 = arith.cmpi eq, %c16_i32, %c0_i32 : i32
    %c1_i32 = arith.constant 1 : i32
    %6 = arith.select %5, %c1_i32, %c16_i32 : i32
    %7 = vector.broadcast %6 : i32 to vector<32x48xi32>
    %8 = arith.remsi %4, %7 : vector<32x48xi32>
    %c0_i32_7 = arith.constant 0 : i32
    %9 = vector.broadcast %c0_i32_7 : i32 to vector<32x48xi32>
    %10 = arith.cmpi ne, %8, %9 : vector<32x48xi32>
    %c0_i32_8 = arith.constant 0 : i32
    %11 = vector.broadcast %c0_i32_8 : i32 to vector<32x48xi32>
    %12 = arith.cmpi slt, %8, %11 : vector<32x48xi32>
    %c0_i32_9 = arith.constant 0 : i32
    %13 = arith.cmpi slt, %6, %c0_i32_9 : i32
    %14 = vector.broadcast %13 : i1 to vector<32x48xi1>
    %15 = vector.broadcast %14 : vector<32x48xi1> to vector<32x48xi1>
    %16 = arith.xori %12, %15 : vector<32x48xi1>
    %17 = arith.andi %16, %10 : vector<32x48xi1>
    %18 = vector.broadcast %6 : i32 to vector<32x48xi32>
    %19 = arith.addi %8, %18 : vector<32x48xi32>
    %20 = arith.select %17, %19, %8 : vector<32x48xi1>, vector<32x48xi32>
    %c0_i32_10 = arith.constant 0 : i32
    %21 = vector.broadcast %c0_i32_10 : i32 to vector<32x48xi32>
    %22 = arith.cmpi ne, %20, %21 : vector<32x48xi32>
    %23 = vector.extract_strided_slice %0 {offsets = [31, 0], sizes = [1, 48], strides = [1, 1]} : vector<32x48xf32> to vector<1x48xf32>
    %24 = vector.extract_strided_slice %0 {offsets = [0, 0], sizes = [31, 48], strides = [1, 1]} : vector<32x48xf32> to vector<31x48xf32>
    %25 = tpu.concatenate %23, %24 in 0 : vector<1x48xf32>, vector<31x48xf32> -> vector<32x48xf32>
    %cst = arith.constant 0.000000e+00 : f32
    %26 = vector.broadcast %cst : f32 to vector<32x48xf32>
    %27 = arith.select %22, %25, %26 : vector<32x48xi1>, vector<32x48xf32>
    %c16_i32_11 = arith.constant 16 : i32
    %c0_i32_12 = arith.constant 0 : i32
    %28 = arith.cmpi eq, %c16_i32_11, %c0_i32_12 : i32
    %c1_i32_13 = arith.constant 1 : i32
    %29 = arith.select %28, %c1_i32_13, %c16_i32_11 : i32
    %30 = vector.broadcast %29 : i32 to vector<32x48xi32>
    %31 = arith.remsi %4, %30 : vector<32x48xi32>
    %c0_i32_14 = arith.constant 0 : i32
    %32 = vector.broadcast %c0_i32_14 : i32 to vector<32x48xi32>
    %33 = arith.cmpi ne, %31, %32 : vector<32x48xi32>
    %c0_i32_15 = arith.constant 0 : i32
    %34 = vector.broadcast %c0_i32_15 : i32 to vector<32x48xi32>
    %35 = arith.cmpi slt, %31, %34 : vector<32x48xi32>
    %c0_i32_16 = arith.constant 0 : i32
    %36 = arith.cmpi slt, %29, %c0_i32_16 : i32
    %37 = vector.broadcast %36 : i1 to vector<32x48xi1>
    %38 = vector.broadcast %37 : vector<32x48xi1> to vector<32x48xi1>
    %39 = arith.xori %35, %38 : vector<32x48xi1>
    %40 = arith.andi %39, %33 : vector<32x48xi1>
    %41 = vector.broadcast %29 : i32 to vector<32x48xi32>
    %42 = arith.addi %31, %41 : vector<32x48xi32>
    %43 = arith.select %40, %42, %31 : vector<32x48xi1>, vector<32x48xi32>
    %c15_i32 = arith.constant 15 : i32
    %44 = vector.broadcast %c15_i32 : i32 to vector<32x48xi32>
    %45 = arith.cmpi ne, %43, %44 : vector<32x48xi32>
    %46 = vector.extract_strided_slice %0 {offsets = [1, 0], sizes = [31, 48], strides = [1, 1]} : vector<32x48xf32> to vector<31x48xf32>
    %47 = vector.extract_strided_slice %0 {offsets = [0, 0], sizes = [1, 48], strides = [1, 1]} : vector<32x48xf32> to vector<1x48xf32>
    %48 = tpu.concatenate %46, %47 in 0 : vector<31x48xf32>, vector<1x48xf32> -> vector<32x48xf32>
    %cst_17 = arith.constant 0.000000e+00 : f32
    %49 = vector.broadcast %cst_17 : f32 to vector<32x48xf32>
    %50 = arith.select %45, %48, %49 : vector<32x48xi1>, vector<32x48xf32>
    %51 = tpu.concatenate %27, %0, %50 in 1 : vector<32x48xf32>, vector<32x48xf32>, vector<32x48xf32> -> vector<32x144xf32>
    %cst_18 = arith.constant dense<0.000000e+00> : vector<32x64xf32>
    %52 = tpu.matmul %51, %1, %cst_18 {dimension_numbers = #tpu.dot_dimension_numbers<[1], [0], [0], [1], [0, 0, 1, 1], [], []>} : vector<32x144xf32>, vector<144x64xf32>, vector<32x64xf32> -> vector<32x64xf32>
    %53 = vector.broadcast %2 : vector<1x64xf32> to vector<32x64xf32>
    %54 = arith.mulf %52, %53 : vector<32x64xf32>
    %55 = vector.broadcast %3 : vector<1x64xf32> to vector<32x64xf32>
    %56 = arith.addf %54, %55 : vector<32x64xf32>
    %cst_19 = arith.constant 0.000000e+00 : f32
    %57 = vector.broadcast %cst_19 : f32 to vector<32x64xf32>
    %58 = arith.maximumf %56, %57 : vector<32x64xf32>
    %c0_20 = arith.constant 0 : index
    %c0_21 = arith.constant 0 : index
    %59 = vector.load %arg4[%c0_20, %c0_21] : memref<192x64xf32, #tpu.memory_space<vmem>>, vector<192x64xf32>
    %c0_22 = arith.constant 0 : index
    %c0_23 = arith.constant 0 : index
    %60 = vector.load %arg5[%c0_22, %c0_23] : memref<1x64xf32, #tpu.memory_space<vmem>>, vector<1x64xf32>
    %c0_24 = arith.constant 0 : index
    %c0_25 = arith.constant 0 : index
    %61 = vector.load %arg6[%c0_24, %c0_25] : memref<1x64xf32, #tpu.memory_space<vmem>>, vector<1x64xf32>
    %62 = tpu.iota {dimensions = array<i32: 0>} : vector<32x64xi32>
    %c16_i32_26 = arith.constant 16 : i32
    %c0_i32_27 = arith.constant 0 : i32
    %63 = arith.cmpi eq, %c16_i32_26, %c0_i32_27 : i32
    %c1_i32_28 = arith.constant 1 : i32
    %64 = arith.select %63, %c1_i32_28, %c16_i32_26 : i32
    %65 = vector.broadcast %64 : i32 to vector<32x64xi32>
    %66 = arith.remsi %62, %65 : vector<32x64xi32>
    %c0_i32_29 = arith.constant 0 : i32
    %67 = vector.broadcast %c0_i32_29 : i32 to vector<32x64xi32>
    %68 = arith.cmpi ne, %66, %67 : vector<32x64xi32>
    %c0_i32_30 = arith.constant 0 : i32
    %69 = vector.broadcast %c0_i32_30 : i32 to vector<32x64xi32>
    %70 = arith.cmpi slt, %66, %69 : vector<32x64xi32>
    %c0_i32_31 = arith.constant 0 : i32
    %71 = arith.cmpi slt, %64, %c0_i32_31 : i32
    %72 = vector.broadcast %71 : i1 to vector<32x64xi1>
    %73 = vector.broadcast %72 : vector<32x64xi1> to vector<32x64xi1>
    %74 = arith.xori %70, %73 : vector<32x64xi1>
    %75 = arith.andi %74, %68 : vector<32x64xi1>
    %76 = vector.broadcast %64 : i32 to vector<32x64xi32>
    %77 = arith.addi %66, %76 : vector<32x64xi32>
    %78 = arith.select %75, %77, %66 : vector<32x64xi1>, vector<32x64xi32>
    %c0_i32_32 = arith.constant 0 : i32
    %79 = vector.broadcast %c0_i32_32 : i32 to vector<32x64xi32>
    %80 = arith.cmpi ne, %78, %79 : vector<32x64xi32>
    %81 = vector.extract_strided_slice %58 {offsets = [31, 0], sizes = [1, 64], strides = [1, 1]} : vector<32x64xf32> to vector<1x64xf32>
    %82 = vector.extract_strided_slice %58 {offsets = [0, 0], sizes = [31, 64], strides = [1, 1]} : vector<32x64xf32> to vector<31x64xf32>
    %83 = tpu.concatenate %81, %82 in 0 : vector<1x64xf32>, vector<31x64xf32> -> vector<32x64xf32>
    %cst_33 = arith.constant 0.000000e+00 : f32
    %84 = vector.broadcast %cst_33 : f32 to vector<32x64xf32>
    %85 = arith.select %80, %83, %84 : vector<32x64xi1>, vector<32x64xf32>
    %c16_i32_34 = arith.constant 16 : i32
    %c0_i32_35 = arith.constant 0 : i32
    %86 = arith.cmpi eq, %c16_i32_34, %c0_i32_35 : i32
    %c1_i32_36 = arith.constant 1 : i32
    %87 = arith.select %86, %c1_i32_36, %c16_i32_34 : i32
    %88 = vector.broadcast %87 : i32 to vector<32x64xi32>
    %89 = arith.remsi %62, %88 : vector<32x64xi32>
    %c0_i32_37 = arith.constant 0 : i32
    %90 = vector.broadcast %c0_i32_37 : i32 to vector<32x64xi32>
    %91 = arith.cmpi ne, %89, %90 : vector<32x64xi32>
    %c0_i32_38 = arith.constant 0 : i32
    %92 = vector.broadcast %c0_i32_38 : i32 to vector<32x64xi32>
    %93 = arith.cmpi slt, %89, %92 : vector<32x64xi32>
    %c0_i32_39 = arith.constant 0 : i32
    %94 = arith.cmpi slt, %87, %c0_i32_39 : i32
    %95 = vector.broadcast %94 : i1 to vector<32x64xi1>
    %96 = vector.broadcast %95 : vector<32x64xi1> to vector<32x64xi1>
    %97 = arith.xori %93, %96 : vector<32x64xi1>
    %98 = arith.andi %97, %91 : vector<32x64xi1>
    %99 = vector.broadcast %87 : i32 to vector<32x64xi32>
    %100 = arith.addi %89, %99 : vector<32x64xi32>
    %101 = arith.select %98, %100, %89 : vector<32x64xi1>, vector<32x64xi32>
    %c15_i32_40 = arith.constant 15 : i32
    %102 = vector.broadcast %c15_i32_40 : i32 to vector<32x64xi32>
    %103 = arith.cmpi ne, %101, %102 : vector<32x64xi32>
    %104 = vector.extract_strided_slice %58 {offsets = [1, 0], sizes = [31, 64], strides = [1, 1]} : vector<32x64xf32> to vector<31x64xf32>
    %105 = vector.extract_strided_slice %58 {offsets = [0, 0], sizes = [1, 64], strides = [1, 1]} : vector<32x64xf32> to vector<1x64xf32>
    %106 = tpu.concatenate %104, %105 in 0 : vector<31x64xf32>, vector<1x64xf32> -> vector<32x64xf32>
    %cst_41 = arith.constant 0.000000e+00 : f32
    %107 = vector.broadcast %cst_41 : f32 to vector<32x64xf32>
    %108 = arith.select %103, %106, %107 : vector<32x64xi1>, vector<32x64xf32>
    %109 = tpu.concatenate %85, %58, %108 in 1 : vector<32x64xf32>, vector<32x64xf32>, vector<32x64xf32> -> vector<32x192xf32>
    %cst_42 = arith.constant dense<0.000000e+00> : vector<32x64xf32>
    %110 = tpu.matmul %109, %59, %cst_42 {dimension_numbers = #tpu.dot_dimension_numbers<[1], [0], [0], [1], [0, 0, 1, 1], [], []>} : vector<32x192xf32>, vector<192x64xf32>, vector<32x64xf32> -> vector<32x64xf32>
    %111 = vector.broadcast %60 : vector<1x64xf32> to vector<32x64xf32>
    %112 = arith.mulf %110, %111 : vector<32x64xf32>
    %113 = vector.broadcast %61 : vector<1x64xf32> to vector<32x64xf32>
    %114 = arith.addf %112, %113 : vector<32x64xf32>
    %cst_43 = arith.constant 0.000000e+00 : f32
    %115 = vector.broadcast %cst_43 : f32 to vector<32x64xf32>
    %116 = arith.maximumf %114, %115 : vector<32x64xf32>
    %117 = vector.extract_strided_slice %116 {offsets = [0, 0], sizes = [4, 64], strides = [1, 1]} : vector<32x64xf32> to vector<4x64xf32>
    %cst_44 = arith.constant dense<0xFF800000> : vector<64xf32>
    %118 = vector.multi_reduction <maximumf>, %117, %cst_44 [0] : vector<4x64xf32> to vector<64xf32>
    %119 = vector.shape_cast %118 : vector<64xf32> to vector<1x64xf32>
    %120 = vector.extract_strided_slice %116 {offsets = [4, 0], sizes = [4, 64], strides = [1, 1]} : vector<32x64xf32> to vector<4x64xf32>
    %cst_45 = arith.constant dense<0xFF800000> : vector<64xf32>
    %121 = vector.multi_reduction <maximumf>, %120, %cst_45 [0] : vector<4x64xf32> to vector<64xf32>
    %122 = vector.shape_cast %121 : vector<64xf32> to vector<1x64xf32>
    %123 = vector.extract_strided_slice %116 {offsets = [8, 0], sizes = [4, 64], strides = [1, 1]} : vector<32x64xf32> to vector<4x64xf32>
    %cst_46 = arith.constant dense<0xFF800000> : vector<64xf32>
    %124 = vector.multi_reduction <maximumf>, %123, %cst_46 [0] : vector<4x64xf32> to vector<64xf32>
    %125 = vector.shape_cast %124 : vector<64xf32> to vector<1x64xf32>
    %126 = vector.extract_strided_slice %116 {offsets = [12, 0], sizes = [4, 64], strides = [1, 1]} : vector<32x64xf32> to vector<4x64xf32>
    %cst_47 = arith.constant dense<0xFF800000> : vector<64xf32>
    %127 = vector.multi_reduction <maximumf>, %126, %cst_47 [0] : vector<4x64xf32> to vector<64xf32>
    %128 = vector.shape_cast %127 : vector<64xf32> to vector<1x64xf32>
    %129 = vector.extract_strided_slice %116 {offsets = [16, 0], sizes = [4, 64], strides = [1, 1]} : vector<32x64xf32> to vector<4x64xf32>
    %cst_48 = arith.constant dense<0xFF800000> : vector<64xf32>
    %130 = vector.multi_reduction <maximumf>, %129, %cst_48 [0] : vector<4x64xf32> to vector<64xf32>
    %131 = vector.shape_cast %130 : vector<64xf32> to vector<1x64xf32>
    %132 = vector.extract_strided_slice %116 {offsets = [20, 0], sizes = [4, 64], strides = [1, 1]} : vector<32x64xf32> to vector<4x64xf32>
    %cst_49 = arith.constant dense<0xFF800000> : vector<64xf32>
    %133 = vector.multi_reduction <maximumf>, %132, %cst_49 [0] : vector<4x64xf32> to vector<64xf32>
    %134 = vector.shape_cast %133 : vector<64xf32> to vector<1x64xf32>
    %135 = vector.extract_strided_slice %116 {offsets = [24, 0], sizes = [4, 64], strides = [1, 1]} : vector<32x64xf32> to vector<4x64xf32>
    %cst_50 = arith.constant dense<0xFF800000> : vector<64xf32>
    %136 = vector.multi_reduction <maximumf>, %135, %cst_50 [0] : vector<4x64xf32> to vector<64xf32>
    %137 = vector.shape_cast %136 : vector<64xf32> to vector<1x64xf32>
    %138 = vector.extract_strided_slice %116 {offsets = [28, 0], sizes = [4, 64], strides = [1, 1]} : vector<32x64xf32> to vector<4x64xf32>
    %cst_51 = arith.constant dense<0xFF800000> : vector<64xf32>
    %139 = vector.multi_reduction <maximumf>, %138, %cst_51 [0] : vector<4x64xf32> to vector<64xf32>
    %140 = vector.shape_cast %139 : vector<64xf32> to vector<1x64xf32>
    %141 = tpu.concatenate %119, %122, %125, %128, %131, %134, %137, %140 in 0 : vector<1x64xf32>, vector<1x64xf32>, vector<1x64xf32>, vector<1x64xf32>, vector<1x64xf32>, vector<1x64xf32>, vector<1x64xf32>, vector<1x64xf32> -> vector<8x64xf32>
    %142 = vector.extract_strided_slice %141 {offsets = [0, 0], sizes = [8, 4], strides = [1, 1]} : vector<8x64xf32> to vector<8x4xf32>
    %143 = vector.extract_strided_slice %141 {offsets = [0, 4], sizes = [8, 4], strides = [1, 1]} : vector<8x64xf32> to vector<8x4xf32>
    %144 = arith.maximumf %142, %143 : vector<8x4xf32>
    %145 = vector.extract_strided_slice %141 {offsets = [0, 8], sizes = [8, 4], strides = [1, 1]} : vector<8x64xf32> to vector<8x4xf32>
    %146 = arith.maximumf %144, %145 : vector<8x4xf32>
    %147 = vector.extract_strided_slice %141 {offsets = [0, 12], sizes = [8, 4], strides = [1, 1]} : vector<8x64xf32> to vector<8x4xf32>
    %148 = arith.maximumf %146, %147 : vector<8x4xf32>
    %149 = vector.extract_strided_slice %141 {offsets = [0, 16], sizes = [8, 4], strides = [1, 1]} : vector<8x64xf32> to vector<8x4xf32>
    %150 = vector.extract_strided_slice %141 {offsets = [0, 20], sizes = [8, 4], strides = [1, 1]} : vector<8x64xf32> to vector<8x4xf32>
    %151 = arith.maximumf %149, %150 : vector<8x4xf32>
    %152 = vector.extract_strided_slice %141 {offsets = [0, 24], sizes = [8, 4], strides = [1, 1]} : vector<8x64xf32> to vector<8x4xf32>
    %153 = arith.maximumf %151, %152 : vector<8x4xf32>
    %154 = vector.extract_strided_slice %141 {offsets = [0, 28], sizes = [8, 4], strides = [1, 1]} : vector<8x64xf32> to vector<8x4xf32>
    %155 = arith.maximumf %153, %154 : vector<8x4xf32>
    %156 = vector.extract_strided_slice %141 {offsets = [0, 32], sizes = [8, 4], strides = [1, 1]} : vector<8x64xf32> to vector<8x4xf32>
    %157 = vector.extract_strided_slice %141 {offsets = [0, 36], sizes = [8, 4], strides = [1, 1]} : vector<8x64xf32> to vector<8x4xf32>
    %158 = arith.maximumf %156, %157 : vector<8x4xf32>
    %159 = vector.extract_strided_slice %141 {offsets = [0, 40], sizes = [8, 4], strides = [1, 1]} : vector<8x64xf32> to vector<8x4xf32>
    %160 = arith.maximumf %158, %159 : vector<8x4xf32>
    %161 = vector.extract_strided_slice %141 {offsets = [0, 44], sizes = [8, 4], strides = [1, 1]} : vector<8x64xf32> to vector<8x4xf32>
    %162 = arith.maximumf %160, %161 : vector<8x4xf32>
    %163 = vector.extract_strided_slice %141 {offsets = [0, 48], sizes = [8, 4], strides = [1, 1]} : vector<8x64xf32> to vector<8x4xf32>
    %164 = vector.extract_strided_slice %141 {offsets = [0, 52], sizes = [8, 4], strides = [1, 1]} : vector<8x64xf32> to vector<8x4xf32>
    %165 = arith.maximumf %163, %164 : vector<8x4xf32>
    %166 = vector.extract_strided_slice %141 {offsets = [0, 56], sizes = [8, 4], strides = [1, 1]} : vector<8x64xf32> to vector<8x4xf32>
    %167 = arith.maximumf %165, %166 : vector<8x4xf32>
    %168 = vector.extract_strided_slice %141 {offsets = [0, 60], sizes = [8, 4], strides = [1, 1]} : vector<8x64xf32> to vector<8x4xf32>
    %169 = arith.maximumf %167, %168 : vector<8x4xf32>
    %170 = tpu.concatenate %148, %155, %162, %169 in 1 : vector<8x4xf32>, vector<8x4xf32>, vector<8x4xf32>, vector<8x4xf32> -> vector<8x16xf32>
    %c0_52 = arith.constant 0 : index
    %c0_53 = arith.constant 0 : index
    %171 = vector.load %arg7[%c0_52, %c0_53] : memref<48x32xf32, #tpu.memory_space<vmem>>, vector<48x32xf32>
    %c0_54 = arith.constant 0 : index
    %c0_55 = arith.constant 0 : index
    %172 = vector.load %arg8[%c0_54, %c0_55] : memref<1x32xf32, #tpu.memory_space<vmem>>, vector<1x32xf32>
    %c0_56 = arith.constant 0 : index
    %c0_57 = arith.constant 0 : index
    %173 = vector.load %arg9[%c0_56, %c0_57] : memref<1x32xf32, #tpu.memory_space<vmem>>, vector<1x32xf32>
    %174 = tpu.iota {dimensions = array<i32: 0>} : vector<8x16xi32>
    %c4_i32 = arith.constant 4 : i32
    %c0_i32_58 = arith.constant 0 : i32
    %175 = arith.cmpi eq, %c4_i32, %c0_i32_58 : i32
    %c1_i32_59 = arith.constant 1 : i32
    %176 = arith.select %175, %c1_i32_59, %c4_i32 : i32
    %177 = vector.broadcast %176 : i32 to vector<8x16xi32>
    %178 = arith.remsi %174, %177 : vector<8x16xi32>
    %c0_i32_60 = arith.constant 0 : i32
    %179 = vector.broadcast %c0_i32_60 : i32 to vector<8x16xi32>
    %180 = arith.cmpi ne, %178, %179 : vector<8x16xi32>
    %c0_i32_61 = arith.constant 0 : i32
    %181 = vector.broadcast %c0_i32_61 : i32 to vector<8x16xi32>
    %182 = arith.cmpi slt, %178, %181 : vector<8x16xi32>
    %c0_i32_62 = arith.constant 0 : i32
    %183 = arith.cmpi slt, %176, %c0_i32_62 : i32
    %184 = vector.broadcast %183 : i1 to vector<8x16xi1>
    %185 = vector.broadcast %184 : vector<8x16xi1> to vector<8x16xi1>
    %186 = arith.xori %182, %185 : vector<8x16xi1>
    %187 = arith.andi %186, %180 : vector<8x16xi1>
    %188 = vector.broadcast %176 : i32 to vector<8x16xi32>
    %189 = arith.addi %178, %188 : vector<8x16xi32>
    %190 = arith.select %187, %189, %178 : vector<8x16xi1>, vector<8x16xi32>
    %c0_i32_63 = arith.constant 0 : i32
    %191 = vector.broadcast %c0_i32_63 : i32 to vector<8x16xi32>
    %192 = arith.cmpi ne, %190, %191 : vector<8x16xi32>
    %193 = vector.extract_strided_slice %170 {offsets = [7, 0], sizes = [1, 16], strides = [1, 1]} : vector<8x16xf32> to vector<1x16xf32>
    %194 = vector.extract_strided_slice %170 {offsets = [0, 0], sizes = [7, 16], strides = [1, 1]} : vector<8x16xf32> to vector<7x16xf32>
    %195 = tpu.concatenate %193, %194 in 0 : vector<1x16xf32>, vector<7x16xf32> -> vector<8x16xf32>
    %cst_64 = arith.constant 0.000000e+00 : f32
    %196 = vector.broadcast %cst_64 : f32 to vector<8x16xf32>
    %197 = arith.select %192, %195, %196 : vector<8x16xi1>, vector<8x16xf32>
    %c4_i32_65 = arith.constant 4 : i32
    %c0_i32_66 = arith.constant 0 : i32
    %198 = arith.cmpi eq, %c4_i32_65, %c0_i32_66 : i32
    %c1_i32_67 = arith.constant 1 : i32
    %199 = arith.select %198, %c1_i32_67, %c4_i32_65 : i32
    %200 = vector.broadcast %199 : i32 to vector<8x16xi32>
    %201 = arith.remsi %174, %200 : vector<8x16xi32>
    %c0_i32_68 = arith.constant 0 : i32
    %202 = vector.broadcast %c0_i32_68 : i32 to vector<8x16xi32>
    %203 = arith.cmpi ne, %201, %202 : vector<8x16xi32>
    %c0_i32_69 = arith.constant 0 : i32
    %204 = vector.broadcast %c0_i32_69 : i32 to vector<8x16xi32>
    %205 = arith.cmpi slt, %201, %204 : vector<8x16xi32>
    %c0_i32_70 = arith.constant 0 : i32
    %206 = arith.cmpi slt, %199, %c0_i32_70 : i32
    %207 = vector.broadcast %206 : i1 to vector<8x16xi1>
    %208 = vector.broadcast %207 : vector<8x16xi1> to vector<8x16xi1>
    %209 = arith.xori %205, %208 : vector<8x16xi1>
    %210 = arith.andi %209, %203 : vector<8x16xi1>
    %211 = vector.broadcast %199 : i32 to vector<8x16xi32>
    %212 = arith.addi %201, %211 : vector<8x16xi32>
    %213 = arith.select %210, %212, %201 : vector<8x16xi1>, vector<8x16xi32>
    %c3_i32 = arith.constant 3 : i32
    %214 = vector.broadcast %c3_i32 : i32 to vector<8x16xi32>
    %215 = arith.cmpi ne, %213, %214 : vector<8x16xi32>
    %216 = vector.extract_strided_slice %170 {offsets = [1, 0], sizes = [7, 16], strides = [1, 1]} : vector<8x16xf32> to vector<7x16xf32>
    %217 = vector.extract_strided_slice %170 {offsets = [0, 0], sizes = [1, 16], strides = [1, 1]} : vector<8x16xf32> to vector<1x16xf32>
    %218 = tpu.concatenate %216, %217 in 0 : vector<7x16xf32>, vector<1x16xf32> -> vector<8x16xf32>
    %cst_71 = arith.constant 0.000000e+00 : f32
    %219 = vector.broadcast %cst_71 : f32 to vector<8x16xf32>
    %220 = arith.select %215, %218, %219 : vector<8x16xi1>, vector<8x16xf32>
    %221 = tpu.concatenate %197, %170, %220 in 1 : vector<8x16xf32>, vector<8x16xf32>, vector<8x16xf32> -> vector<8x48xf32>
    %cst_72 = arith.constant dense<0.000000e+00> : vector<8x32xf32>
    %222 = tpu.matmul %221, %171, %cst_72 {dimension_numbers = #tpu.dot_dimension_numbers<[1], [0], [0], [1], [0, 0, 1, 1], [], []>} : vector<8x48xf32>, vector<48x32xf32>, vector<8x32xf32> -> vector<8x32xf32>
    %223 = vector.broadcast %172 : vector<1x32xf32> to vector<8x32xf32>
    %224 = arith.mulf %222, %223 : vector<8x32xf32>
    %225 = vector.broadcast %173 : vector<1x32xf32> to vector<8x32xf32>
    %226 = arith.addf %224, %225 : vector<8x32xf32>
    %cst_73 = arith.constant 0.000000e+00 : f32
    %227 = vector.broadcast %cst_73 : f32 to vector<8x32xf32>
    %228 = arith.maximumf %226, %227 : vector<8x32xf32>
    %229 = vector.extract_strided_slice %228 {offsets = [0, 0], sizes = [2, 32], strides = [1, 1]} : vector<8x32xf32> to vector<2x32xf32>
    %cst_74 = arith.constant dense<0xFF800000> : vector<32xf32>
    %230 = vector.multi_reduction <maximumf>, %229, %cst_74 [0] : vector<2x32xf32> to vector<32xf32>
    %231 = vector.shape_cast %230 : vector<32xf32> to vector<1x32xf32>
    %232 = vector.extract_strided_slice %228 {offsets = [2, 0], sizes = [2, 32], strides = [1, 1]} : vector<8x32xf32> to vector<2x32xf32>
    %cst_75 = arith.constant dense<0xFF800000> : vector<32xf32>
    %233 = vector.multi_reduction <maximumf>, %232, %cst_75 [0] : vector<2x32xf32> to vector<32xf32>
    %234 = vector.shape_cast %233 : vector<32xf32> to vector<1x32xf32>
    %235 = vector.extract_strided_slice %228 {offsets = [4, 0], sizes = [2, 32], strides = [1, 1]} : vector<8x32xf32> to vector<2x32xf32>
    %cst_76 = arith.constant dense<0xFF800000> : vector<32xf32>
    %236 = vector.multi_reduction <maximumf>, %235, %cst_76 [0] : vector<2x32xf32> to vector<32xf32>
    %237 = vector.shape_cast %236 : vector<32xf32> to vector<1x32xf32>
    %238 = vector.extract_strided_slice %228 {offsets = [6, 0], sizes = [2, 32], strides = [1, 1]} : vector<8x32xf32> to vector<2x32xf32>
    %cst_77 = arith.constant dense<0xFF800000> : vector<32xf32>
    %239 = vector.multi_reduction <maximumf>, %238, %cst_77 [0] : vector<2x32xf32> to vector<32xf32>
    %240 = vector.shape_cast %239 : vector<32xf32> to vector<1x32xf32>
    %241 = tpu.concatenate %231, %234, %237, %240 in 0 : vector<1x32xf32>, vector<1x32xf32>, vector<1x32xf32>, vector<1x32xf32> -> vector<4x32xf32>
    %242 = vector.extract_strided_slice %241 {offsets = [0, 0], sizes = [4, 8], strides = [1, 1]} : vector<4x32xf32> to vector<4x8xf32>
    %243 = vector.extract_strided_slice %241 {offsets = [0, 8], sizes = [4, 8], strides = [1, 1]} : vector<4x32xf32> to vector<4x8xf32>
    %244 = arith.maximumf %242, %243 : vector<4x8xf32>
    %245 = vector.extract_strided_slice %241 {offsets = [0, 16], sizes = [4, 8], strides = [1, 1]} : vector<4x32xf32> to vector<4x8xf32>
    %246 = vector.extract_strided_slice %241 {offsets = [0, 24], sizes = [4, 8], strides = [1, 1]} : vector<4x32xf32> to vector<4x8xf32>
    %247 = arith.maximumf %245, %246 : vector<4x8xf32>
    %248 = tpu.concatenate %244, %247 in 1 : vector<4x8xf32>, vector<4x8xf32> -> vector<4x16xf32>
    %c0_78 = arith.constant 0 : index
    %c0_79 = arith.constant 0 : index
    %249 = vector.load %arg10[%c0_78, %c0_79] : memref<48x16xf32, #tpu.memory_space<vmem>>, vector<48x16xf32>
    %c0_80 = arith.constant 0 : index
    %c0_81 = arith.constant 0 : index
    %250 = vector.load %arg11[%c0_80, %c0_81] : memref<1x16xf32, #tpu.memory_space<vmem>>, vector<1x16xf32>
    %c0_82 = arith.constant 0 : index
    %c0_83 = arith.constant 0 : index
    %251 = vector.load %arg12[%c0_82, %c0_83] : memref<1x16xf32, #tpu.memory_space<vmem>>, vector<1x16xf32>
    %252 = tpu.iota {dimensions = array<i32: 0>} : vector<4x16xi32>
    %c2_i32 = arith.constant 2 : i32
    %c0_i32_84 = arith.constant 0 : i32
    %253 = arith.cmpi eq, %c2_i32, %c0_i32_84 : i32
    %c1_i32_85 = arith.constant 1 : i32
    %254 = arith.select %253, %c1_i32_85, %c2_i32 : i32
    %255 = vector.broadcast %254 : i32 to vector<4x16xi32>
    %256 = arith.remsi %252, %255 : vector<4x16xi32>
    %c0_i32_86 = arith.constant 0 : i32
    %257 = vector.broadcast %c0_i32_86 : i32 to vector<4x16xi32>
    %258 = arith.cmpi ne, %256, %257 : vector<4x16xi32>
    %c0_i32_87 = arith.constant 0 : i32
    %259 = vector.broadcast %c0_i32_87 : i32 to vector<4x16xi32>
    %260 = arith.cmpi slt, %256, %259 : vector<4x16xi32>
    %c0_i32_88 = arith.constant 0 : i32
    %261 = arith.cmpi slt, %254, %c0_i32_88 : i32
    %262 = vector.broadcast %261 : i1 to vector<4x16xi1>
    %263 = vector.broadcast %262 : vector<4x16xi1> to vector<4x16xi1>
    %264 = arith.xori %260, %263 : vector<4x16xi1>
    %265 = arith.andi %264, %258 : vector<4x16xi1>
    %266 = vector.broadcast %254 : i32 to vector<4x16xi32>
    %267 = arith.addi %256, %266 : vector<4x16xi32>
    %268 = arith.select %265, %267, %256 : vector<4x16xi1>, vector<4x16xi32>
    %c0_i32_89 = arith.constant 0 : i32
    %269 = vector.broadcast %c0_i32_89 : i32 to vector<4x16xi32>
    %270 = arith.cmpi ne, %268, %269 : vector<4x16xi32>
    %271 = vector.extract_strided_slice %248 {offsets = [3, 0], sizes = [1, 16], strides = [1, 1]} : vector<4x16xf32> to vector<1x16xf32>
    %272 = vector.extract_strided_slice %248 {offsets = [0, 0], sizes = [3, 16], strides = [1, 1]} : vector<4x16xf32> to vector<3x16xf32>
    %273 = tpu.concatenate %271, %272 in 0 : vector<1x16xf32>, vector<3x16xf32> -> vector<4x16xf32>
    %cst_90 = arith.constant 0.000000e+00 : f32
    %274 = vector.broadcast %cst_90 : f32 to vector<4x16xf32>
    %275 = arith.select %270, %273, %274 : vector<4x16xi1>, vector<4x16xf32>
    %c2_i32_91 = arith.constant 2 : i32
    %c0_i32_92 = arith.constant 0 : i32
    %276 = arith.cmpi eq, %c2_i32_91, %c0_i32_92 : i32
    %c1_i32_93 = arith.constant 1 : i32
    %277 = arith.select %276, %c1_i32_93, %c2_i32_91 : i32
    %278 = vector.broadcast %277 : i32 to vector<4x16xi32>
    %279 = arith.remsi %252, %278 : vector<4x16xi32>
    %c0_i32_94 = arith.constant 0 : i32
    %280 = vector.broadcast %c0_i32_94 : i32 to vector<4x16xi32>
    %281 = arith.cmpi ne, %279, %280 : vector<4x16xi32>
    %c0_i32_95 = arith.constant 0 : i32
    %282 = vector.broadcast %c0_i32_95 : i32 to vector<4x16xi32>
    %283 = arith.cmpi slt, %279, %282 : vector<4x16xi32>
    %c0_i32_96 = arith.constant 0 : i32
    %284 = arith.cmpi slt, %277, %c0_i32_96 : i32
    %285 = vector.broadcast %284 : i1 to vector<4x16xi1>
    %286 = vector.broadcast %285 : vector<4x16xi1> to vector<4x16xi1>
    %287 = arith.xori %283, %286 : vector<4x16xi1>
    %288 = arith.andi %287, %281 : vector<4x16xi1>
    %289 = vector.broadcast %277 : i32 to vector<4x16xi32>
    %290 = arith.addi %279, %289 : vector<4x16xi32>
    %291 = arith.select %288, %290, %279 : vector<4x16xi1>, vector<4x16xi32>
    %c1_i32_97 = arith.constant 1 : i32
    %292 = vector.broadcast %c1_i32_97 : i32 to vector<4x16xi32>
    %293 = arith.cmpi ne, %291, %292 : vector<4x16xi32>
    %294 = vector.extract_strided_slice %248 {offsets = [1, 0], sizes = [3, 16], strides = [1, 1]} : vector<4x16xf32> to vector<3x16xf32>
    %295 = vector.extract_strided_slice %248 {offsets = [0, 0], sizes = [1, 16], strides = [1, 1]} : vector<4x16xf32> to vector<1x16xf32>
    %296 = tpu.concatenate %294, %295 in 0 : vector<3x16xf32>, vector<1x16xf32> -> vector<4x16xf32>
    %cst_98 = arith.constant 0.000000e+00 : f32
    %297 = vector.broadcast %cst_98 : f32 to vector<4x16xf32>
    %298 = arith.select %293, %296, %297 : vector<4x16xi1>, vector<4x16xf32>
    %299 = tpu.concatenate %275, %248, %298 in 1 : vector<4x16xf32>, vector<4x16xf32>, vector<4x16xf32> -> vector<4x48xf32>
    %cst_99 = arith.constant dense<0.000000e+00> : vector<4x16xf32>
    %300 = tpu.matmul %299, %249, %cst_99 {dimension_numbers = #tpu.dot_dimension_numbers<[1], [0], [0], [1], [0, 0, 1, 1], [], []>} : vector<4x48xf32>, vector<48x16xf32>, vector<4x16xf32> -> vector<4x16xf32>
    %301 = vector.broadcast %250 : vector<1x16xf32> to vector<4x16xf32>
    %302 = arith.mulf %300, %301 : vector<4x16xf32>
    %303 = vector.broadcast %251 : vector<1x16xf32> to vector<4x16xf32>
    %304 = arith.addf %302, %303 : vector<4x16xf32>
    %cst_100 = arith.constant 0.000000e+00 : f32
    %305 = vector.broadcast %cst_100 : f32 to vector<4x16xf32>
    %306 = arith.maximumf %304, %305 : vector<4x16xf32>
    %307 = vector.extract_strided_slice %306 {offsets = [0, 0], sizes = [2, 16], strides = [1, 1]} : vector<4x16xf32> to vector<2x16xf32>
    %cst_101 = arith.constant dense<0xFF800000> : vector<16xf32>
    %308 = vector.multi_reduction <maximumf>, %307, %cst_101 [0] : vector<2x16xf32> to vector<16xf32>
    %309 = vector.shape_cast %308 : vector<16xf32> to vector<1x16xf32>
    %310 = vector.extract_strided_slice %306 {offsets = [2, 0], sizes = [2, 16], strides = [1, 1]} : vector<4x16xf32> to vector<2x16xf32>
    %cst_102 = arith.constant dense<0xFF800000> : vector<16xf32>
    %311 = vector.multi_reduction <maximumf>, %310, %cst_102 [0] : vector<2x16xf32> to vector<16xf32>
    %312 = vector.shape_cast %311 : vector<16xf32> to vector<1x16xf32>
    %313 = tpu.concatenate %309, %312 in 0 : vector<1x16xf32>, vector<1x16xf32> -> vector<2x16xf32>
    %314 = vector.extract_strided_slice %313 {offsets = [0, 0], sizes = [2, 8], strides = [1, 1]} : vector<2x16xf32> to vector<2x8xf32>
    %315 = vector.extract_strided_slice %313 {offsets = [0, 8], sizes = [2, 8], strides = [1, 1]} : vector<2x16xf32> to vector<2x8xf32>
    %316 = arith.maximumf %314, %315 : vector<2x8xf32>
    %c0_103 = arith.constant 0 : index
    %c0_104 = arith.constant 0 : index
    %317 = vector.load %arg13[%c0_103, %c0_104] : memref<1x8xf32, #tpu.memory_space<vmem>>, vector<1x8xf32>
    %318 = vector.broadcast %317 : vector<1x8xf32> to vector<2x8xf32>
    %319 = arith.mulf %316, %318 : vector<2x8xf32>
    %cst_105 = arith.constant dense<0.000000e+00> : vector<2xf32>
    %320 = vector.multi_reduction <add>, %319, %cst_105 [1] : vector<2x8xf32> to vector<2xf32>
    %321 = vector.shape_cast %320 : vector<2xf32> to vector<2x1xf32>
    %c0_106 = arith.constant 0 : index
    %c0_107 = arith.constant 0 : index
    %322 = vector.load %arg14[%c0_106, %c0_107] : memref<1x1xf32, #tpu.memory_space<vmem>>, vector<1x1xf32>
    %323 = vector.broadcast %322 : vector<1x1xf32> to vector<2x1xf32>
    %324 = arith.addf %321, %323 : vector<2x1xf32>
    %cst_108 = arith.constant 0.000000e+00 : f32
    %325 = vector.broadcast %cst_108 : f32 to vector<2x1xf32>
    %326 = arith.subf %325, %324 : vector<2x1xf32>
    %327 = math.exp %326 : vector<2x1xf32>
    %cst_109 = arith.constant 1.000000e+00 : f32
    %328 = vector.broadcast %cst_109 : f32 to vector<2x1xf32>
    %329 = arith.addf %328, %327 : vector<2x1xf32>
    %cst_110 = arith.constant 1.000000e+00 : f32
    %330 = vector.broadcast %cst_110 : f32 to vector<2x1xf32>
    %331 = arith.divf %330, %329 : vector<2x1xf32>
    %c0_111 = arith.constant 0 : index
    %c0_112 = arith.constant 0 : index
    %332 = vector.load %arg15[%c0_111, %c0_112] : memref<2x1xf32, #tpu.memory_space<vmem>>, vector<2x1xf32>
    tpu.vector_store %arg15[%c0_111, %c0_112], %331 {strides = array<i32>} : memref<2x1xf32, #tpu.memory_space<vmem>>, vector<2x1xf32>,
    return
  }
}

</mosaic_0001>

<bundles_post_ra>
// kernel: tile.43
= control target key start
LH: loop header
LB: loop body
LE: loop exit
PB: predicated region body
PF: predicated region fallthrough
CT: control target
= control target key end

     0   :  { %s28_s0 = inlined_call_operand.vmem [shape: f32[4], index: 0, kind: input, shape index: {}]   ;;  %s29_s1 = inlined_call_operand.vmem [shape: f32[16,4], index: 1, kind: output, shape index: {}]  }
   0x1   :  { %v4_v0 = vld [vmem:[%s28_s0] ss:$0 sm:$0xff] }
   0x2   :  { %5 = vst [vmem:[%s29_s1] sm:$0xff] %v4_v0  ;;  %8 = vst [vmem:[%s29_s1 + $0x8] sm:$0xff] %v4_v0 }

// kernel: tile.44
= control target key start
LH: loop header
LB: loop body
LE: loop exit
PB: predicated region body
PF: predicated region fallthrough
CT: control target
= control target key end

     0   :  { %s131_s10 = smov 60   ;;  %s132_s11 = smov 52   ;;  %vm3_vm0 = vcmask 31744   ;;  %vm9_vm1 = vcmask 523744   ;;  %vm15_vm2 = vcmask 490944   ;;  %vm21_vm3 = vcmask 458144   ;;  %s207_s0 = inlined_call_operand.vmem [shape: f32[16,4], index: 0, kind: input, shape index: {}]   ;;  %s208_s1 = inlined_call_operand.vmem [shape: f32[1,64], index: 1, kind: output, shape index: {}]  }
   0x1   :  { %v101_v0 = vld [vmem:[%s207_s0 + $0xf] sm:$0x1]   ;;  %v103_v1 = vld [vmem:[%s207_s0 + $0xd] sm:$0x1]   ;;  %v102_v2 = vld [vmem:[%s207_s0 + $0xe] sm:$0x1]  }
   0x2   :  { %7 = vrot.lane.b32.xlu0 %v101_v0, %s131_s10  ;;  %19 = vrot.lane.b32.xlu1 %v103_v1, %s132_s11  ;;  %v104_v3 = vld [vmem:[%s207_s0 + $0xc] sm:$0x1]   ;;  %s133_s16 = smov 56   ;;  %s134_s17 = smov 48   ;;  %v105_v4 = vld [vmem:[%s207_s0 + $0xb] sm:$0x1]  }
   0x3   :  { %v106_v5 = vld [vmem:[%s207_s0 + $0xa] sm:$0x1]   ;;  %v2_v6 = vld [vmem:[%s207_s0] sm:$0x1]   ;;  %s135_s24 = smov 44   ;;  %s136_s25 = smov 40  }
   0x4   :  { %4 = vst.msk [vmem:[#allocation0] sm:$0x1] %vm3_vm0, %v2_v6   ;;  %v107_v7 = vld [vmem:[%s207_s0 + $0x9] sm:$0x1]   ;;  %v108_v8 = vld [vmem:[%s207_s0 + $0x8] sm:$0x1]  }
   0x5   :  { %s137_s30 = smov 36   ;;  %s138_s2 = smov 32   ;;  %v109_v9 = vld [vmem:[%s207_s0 + $0x7] sm:$0x1]   ;;  %v110_v10 = vld [vmem:[%s207_s0 + $0x6] sm:$0x1]  }
   0x6   :  { %13 = vrot.lane.b32.xlu0 %v102_v2, %s133_s16  ;;  %25 = vrot.lane.b32.xlu1 %v104_v3, %s134_s17  ;;  %s139_s7 = smov 28   ;;  %s140_s8 = smov 24   ;;  %v111_v11 = vld [vmem:[%s207_s0 + $0x5] sm:$0x1]   ;;  %v112_v12 = vld [vmem:[%s207_s0 + $0x4] sm:$0x1]  }
   0x7   :  { %s141_s13 = smov 20   ;;  %s142_s14 = smov 16   ;;  %v113_v13 = vld [vmem:[%s207_s0 + $0x3] sm:$0x1]   ;;  %v114_v14 = vld [vmem:[%s207_s0 + $0x2] sm:$0x1]  }
   0x8   :  { %s143_s19 = smov 12   ;;  %s144_s20 = smov 8   ;;  %v115_v15 = vld [vmem:[%s207_s0 + $0x1] sm:$0x1]   ;;  %vm27_vm4 = vcmask 425344   ;;  %vm33_vm5 = vcmask 392544  }
   0x9   :  { %s145_s0 = smov 4   ;;  %vm39_vm6 = vcmask 359744   ;;  %vm45_vm7 = vcmask 326944   ;;  %vm51_vm8 = vcmask 294144   ;;  %vm57_vm9 = vcmask 261344  }
   0xa   :  { %31 = vrot.lane.b32.xlu0 %v105_v4, %s135_s24  ;;  %37 = vrot.lane.b32.xlu1 %v106_v5, %s136_s25  ;;  %vm63_vm10 = vcmask 228544   ;;  %vm69_vm11 = vcmask 195744   ;;  %vm75_vm12 = vcmask 162944   ;;  %vm81_vm13 = vcmask 130144  }
   0xb   :  { %vm87_vm14 = vcmask 97344   ;;  %vm93_vm15 = vcmask 64544  }
   0xe   :  { %43 = vrot.lane.b32.xlu0 %v107_v7, %s137_s30  ;;  %49 = vrot.lane.b32.xlu1 %v108_v8, %s138_s2 }
  0x12   :  { %55 = vrot.lane.b32.xlu0 %v109_v9, %s139_s7  ;;  %61 = vrot.lane.b32.xlu1 %v110_v10, %s140_s8 }
  0x16   :  { %67 = vrot.lane.b32.xlu0 %v111_v11, %s141_s13  ;;  %73 = vrot.lane.b32.xlu1 %v112_v12, %s142_s14 }
  0x1a   :  { %79 = vrot.lane.b32.xlu0 %v113_v13, %s143_s19  ;;  %85 = vrot.lane.b32.xlu1 %v114_v14, %s144_s20 }
  0x1e   :  { %91 = vrot.lane.b32.xlu0 %v115_v15, %s145_s0 }
  0x74   :  { %v8_v16 = vpop.permute.xlu0 %7   ;;  %v20_v17 = vpop.permute.xlu1 %19  }
  0x75   :  { %10 = vst.msk [vmem:[#allocation0] sm:$0x1] %vm9_vm1, %v8_v16  }
  0x78   :  { %v14_v18 = vpop.permute.xlu0 %13   ;;  %v26_v19 = vpop.permute.xlu1 %25  }
  0x79   :  { %16 = vst.msk [vmem:[#allocation0] sm:$0x1] %vm15_vm2, %v14_v18  }
  0x7a   :  { %22 = vst.msk [vmem:[#allocation0] sm:$0x1] %vm21_vm3, %v20_v17  }
  0x7b   :  { %28 = vst.msk [vmem:[#allocation0] sm:$0x1] %vm27_vm4, %v26_v19  }
  0x7c   :  { %v32_v20 = vpop.permute.xlu0 %31   ;;  %v38_v21 = vpop.permute.xlu1 %37  }
  0x7d   :  { %34 = vst.msk [vmem:[#allocation0] sm:$0x1] %vm33_vm5, %v32_v20  }
  0x7e   :  { %40 = vst.msk [vmem:[#allocation0] sm:$0x1] %vm39_vm6, %v38_v21  }
  0x80   :  { %v44_v22 = vpop.permute.xlu0 %43   ;;  %v50_v23 = vpop.permute.xlu1 %49  }
  0x81   :  { %46 = vst.msk [vmem:[#allocation0] sm:$0x1] %vm45_vm7, %v44_v22  }
  0x82   :  { %52 = vst.msk [vmem:[#allocation0] sm:$0x1] %vm51_vm8, %v50_v23  }
  0x84   :  { %v56_v24 = vpop.permute.xlu0 %55   ;;  %v62_v25 = vpop.permute.xlu1 %61  }
  0x85   :  { %58 = vst.msk [vmem:[#allocation0] sm:$0x1] %vm57_vm9, %v56_v24  }
  0x86   :  { %64 = vst.msk [vmem:[#allocation0] sm:$0x1] %vm63_vm10, %v62_v25  }
  0x88   :  { %v68_v26 = vpop.permute.xlu0 %67   ;;  %v74_v27 = vpop.permute.xlu1 %73  }
  0x89   :  { %70 = vst.msk [vmem:[#allocation0] sm:$0x1] %vm69_vm11, %v68_v26  }
  0x8a   :  { %76 = vst.msk [vmem:[#allocation0] sm:$0x1] %vm75_vm12, %v74_v27  }
  0x8c   :  { %v80_v28 = vpop.permute.xlu0 %79   ;;  %v86_v29 = vpop.permute.xlu1 %85  }
  0x8d   :  { %82 = vst.msk [vmem:[#allocation0] sm:$0x1] %vm81_vm13, %v80_v28  }
  0x8e   :  { %88 = vst.msk [vmem:[#allocation0] sm:$0x1] %vm87_vm14, %v86_v29  }
  0x90   :  { %v92_v30 = vpop.permute.xlu0 %91  }
  0x91   :  { %94 = vst.msk [vmem:[#allocation0] sm:$0x1] %vm93_vm15, %v92_v30  }
  0x98   :  { %v98_v31 = vld [vmem:[#allocation0] sm:$0x1] }
  0x99   :  { %100 = vst [vmem:[%s208_s1] sm:$0x1] %v98_v31 }

// kernel: tile.63
= control target key start
LH: loop header
LB: loop body
LE: loop exit
PB: predicated region body
PF: predicated region fallthrough
CT: control target
= control target key end

     0   :  { %s22_s0 = inlined_call_operand.vmem [shape: f32[8], index: 0, kind: input, shape index: {}]   ;;  %s23_s1 = inlined_call_operand.vmem [shape: f32[4,8], index: 1, kind: output, shape index: {}]  }
   0x1   :  { %v4_v0 = vld [vmem:[%s22_s0] ss:$0 sm:$0xff] }
   0x2   :  { %5 = vst [vmem:[%s23_s1] sm:$0xf] %v4_v0 }

// kernel: tile.64
= control target key start
LH: loop header
LB: loop body
LE: loop exit
PB: predicated region body
PF: predicated region fallthrough
CT: control target
= control target key end

     0   :  { %vm7_vm0 = vcmask 64512   ;;  %s37_s8 = smov 8   ;;  %s38_s9 = smov 16   ;;  %vm13_vm1 = vcmask 261312   ;;  %vm19_vm2 = vcmask 195712   ;;  %vm25_vm3 = vcmask 130112   ;;  %s55_s0 = inlined_call_operand.vmem [shape: f32[4,8], index: 0, kind: input, shape index: {}]   ;;  %s56_s1 = inlined_call_operand.vmem [shape: f32[1,32], index: 1, kind: output, shape index: {}]  }
   0x1   :  { %v4_v0 = vld [vmem:[%s55_s0] sm:$0xf]  ;;  %s36_s0 = smov 24  }
   0x2   :  { %5 = vst [vmem:[#allocation1] sm:$0xf] %v4_v0 }
   0x9   :  { %v10_v1 = vld [vmem:[#allocation1 + $0x3] sm:$0x1]   ;;  %v22_v2 = vld [vmem:[#allocation1 + $0x1] sm:$0x1]   ;;  %v6_v3 = vld [vmem:[#allocation1] sm:$0x1]  }
   0xa   :  { %11 = vrot.lane.b32.xlu0 %v10_v1, %s36_s0  ;;  %23 = vrot.lane.b32.xlu1 %v22_v2, %s37_s8  ;;  %v16_v4 = vld [vmem:[#allocation1 + $0x2] sm:$0x1]   ;;  %8 = vst.msk [vmem:[#allocation0] sm:$0x1] %vm7_vm0, %v6_v3  }
   0xe   :  { %17 = vrot.lane.b32.xlu0 %v16_v4, %s38_s9 }
  0x7c   :  { %v12_v5 = vpop.permute.xlu0 %11   ;;  %v24_v6 = vpop.permute.xlu1 %23  }
  0x7d   :  { %14 = vst.msk [vmem:[#allocation0] sm:$0x1] %vm13_vm1, %v12_v5  }
  0x80   :  { %v18_v7 = vpop.permute.xlu0 %17  }
  0x81   :  { %20 = vst.msk [vmem:[#allocation0] sm:$0x1] %vm19_vm2, %v18_v7  }
  0x82   :  { %26 = vst.msk [vmem:[#allocation0] sm:$0x1] %vm25_vm3, %v24_v6  }
  0x89   :  { %v30_v8 = vld [vmem:[#allocation0] sm:$0x1] }
  0x8a   :  { %32 = vst [vmem:[%s56_s1] sm:$0x1] %v30_v8 }

// kernel: tile.73
= control target key start
LH: loop header
LB: loop body
LE: loop exit
PB: predicated region body
PF: predicated region fallthrough
CT: control target
= control target key end

     0   :  { %s22_s0 = inlined_call_operand.vmem [shape: f32[8], index: 0, kind: input, shape index: {}]   ;;  %s23_s1 = inlined_call_operand.vmem [shape: f32[2,8], index: 1, kind: output, shape index: {}]  }
   0x1   :  { %v4_v0 = vld [vmem:[%s22_s0] ss:$0 sm:$0xff] }
   0x2   :  { %5 = vst [vmem:[%s23_s1] sm:$0x3] %v4_v0 }

// kernel: tile.74
= control target key start
LH: loop header
LB: loop body
LE: loop exit
PB: predicated region body
PF: predicated region fallthrough
CT: control target
= control target key end

     0   :  { %vm7_vm0 = vcmask 64512   ;;  %vm13_vm1 = vcmask 130112   ;;  %s39_s0 = inlined_call_operand.vmem [shape: f32[2,8], index: 0, kind: input, shape index: {}]   ;;  %s40_s1 = inlined_call_operand.vmem [shape: f32[1,16], index: 1, kind: output, shape index: {}]  }
   0x1   :  { %v4_v0 = vld [vmem:[%s39_s0] sm:$0x3]  ;;  %s22_s0 = smov 8  }
   0x2   :  { %5 = vst [vmem:[#allocation1] sm:$0x3] %v4_v0 }
   0x9   :  { %v10_v1 = vld [vmem:[#allocation1 + $0x1] sm:$0x1]   ;;  %v6_v2 = vld [vmem:[#allocation1] sm:$0x1]  }
   0xa   :  { %11 = vrot.lane.b32.xlu0 %v10_v1, %s22_s0  ;;  %8 = vst.msk [vmem:[#allocation0] sm:$0x1] %vm7_vm0, %v6_v2  }
  0x7c   :  { %v12_v3 = vpop.permute.xlu0 %11  }
  0x7d   :  { %14 = vst.msk [vmem:[#allocation0] sm:$0x1] %vm13_vm1, %v12_v3  }
  0x84   :  { %v18_v4 = vld [vmem:[#allocation0] sm:$0x1] }
  0x85   :  { %20 = vst [vmem:[%s40_s1] sm:$0x1] %v18_v4 }

// kernel: vgg16_forward.1
= control target key start
LH: loop header
LB: loop body
LE: loop exit
PB: predicated region body
PF: predicated region fallthrough
CT: control target
= control target key end

     0   :  { %v76_v0 = vlaneseq  ;;  %vm159_vm0 = vcmask 1046528   ;;  %v1156_v4 = vmov 0.0|0.0   ;;  %s1157_s24 = smov 48   ;;  %vm139_vm1 = vcmask 1040384   ;;  %s1162_s19 = smov 116   ;;  %s1612_s0 = inlined_call_operand.vmem [shape: f32[32,48], index: 0, kind: input, shape index: {}]   ;;  %s1613_s1 = inlined_call_operand.vmem [shape: f32[144,64], index: 1, kind: input, shape index: {}]   ;;  %s1614_s4 = inlined_call_operand.vmem [shape: f32[192,64], index: 4, kind: input, shape index: {}]   ;;  %s1615_s2 = inlined_call_operand.vmem [shape: f32[1,64], index: 2, kind: input, shape index: {}]   ;;  %s1616_s3 = inlined_call_operand.vmem [shape: f32[1,64], index: 3, kind: input, shape index: {}]   ;;  %s1617_s5 = inlined_call_operand.vmem [shape: f32[1,64], index: 5, kind: input, shape index: {}]   ;;  %s1618_s6 = inlined_call_operand.vmem [shape: f32[1,64], index: 6, kind: input, shape index: {}]   ;;  %s1619_s7 = inlined_call_operand.vmem [shape: f32[48,32], index: 7, kind: input, shape index: {}]   ;;  %s1620_s8 = inlined_call_operand.vmem [shape: f32[1,32], index: 8, kind: input, shape index: {}]   ;;  %s1621_s9 = inlined_call_operand.vmem [shape: f32[1,32], index: 9, kind: input, shape index: {}]   ;;  %s1622_s10 = inlined_call_operand.vmem [shape: f32[48,16], index: 10, kind: input, shape index: {}]   ;;  %s1623_s11 = inlined_call_operand.vmem [shape: f32[1,16], index: 11, kind: input, shape index: {}]   ;;  %s1624_s12 = inlined_call_operand.vmem [shape: f32[1,16], index: 12, kind: input, shape index: {}]   ;;  %s1625_s14 = inlined_call_operand.<no memory space> [shape: f32[1,1], index: 14, kind: input, shape index: {}]   ;;  %s1626_s13 = inlined_call_operand.vmem [shape: f32[1,8], index: 13, kind: input, shape index: {}]   ;;  %s1627_s15 = inlined_call_operand.vmem [shape: f32[2,1], index: 15, kind: output, shape index: {}]  }
   0x1   :  { %v52_v1 = vld [vmem:[%s1612_s0] sm:$0xff]  ;;  %v53_v2 = vld [vmem:[%s1612_s0 + $0x8] sm:$0xff]  ;;  %v54_v3 = vld [vmem:[%s1612_s0 + $0x10] sm:$0xff]  ;;  %1058 = vmatprep.subr.bf16.mxu0 %v1156_v4  ;;  %1085 = vmatprep.subr.bf16.mxu1 %v1156_v4  ;;  %vm205_vm5 = vcmask 392192   ;;  %vm215_vm6 = vcmask 130048   ;;  %vm210_vm7 = vcmask 785408  }
   0x2   :  { %177 = vrot.lane.b32.xlu0 %v52_v1, %s1157_s24  ;;  %v160_v5 = vrot.slane %v52_v1, 1  ;;  %179 = vrot.lane.b32.xlu1 %v53_v2, %s1157_s24  ;;  %v161_v6 = vrot.slane %v53_v2, 1  ;;  %v55_v7 = vld [vmem:[%s1612_s0 + $0x18] sm:$0xff]  ;;  %v56_v8 = vld [vmem:[%s1613_s1] sm:$0xff]  ;;  %v1268_v9 = vshrl.u32 %v76_v0, 7  ;;  %v163_v10 = vrot.slane %v54_v3, 1 }
   0x3   :  { %v57_v11 = vld [vmem:[%s1613_s1 + $0x8] sm:$0xff]  ;;  %v58_v12 = vld [vmem:[%s1613_s1 + $0x10] sm:$0xff]  ;;  %v59_v13 = vld [vmem:[%s1613_s1 + $0x18] sm:$0xff]  ;;  %v140_v14 = vrot.slane %v52_v1, 7  ;;  %v134_v17 = vrot.slane %v55_v7, 7  ;;  %v141_v20 = vrot.slane %v53_v2, 7 }
   0x4   :  { %v162_v15 = vsel %vm159_vm0, %v160_v5, %v161_v6  ;;  %v1059_v16 = vpack.c.bf16 %v57_v11, %v56_v8  ;;  %v78_v18 = vadd.s32 8, %v1268_v9  ;;  %v80_v19 = vadd.s32 24, %v1268_v9  ;;  %s1158_s0 = smov 96   ;;  %v60_v24 = vld [vmem:[%s1613_s1 + $0x20] sm:$0xff]  ;;  %v61_v25 = vld [vmem:[%s1613_s1 + $0x28] sm:$0xff]  ;;  %v62_v33 = vld [vmem:[%s1613_s1 + $0x30] sm:$0xff] }
   0x5   :  { %v1062_v21 = vpack.c.bf16 %v59_v13, %v58_v12  ;;  %v164_v23 = vsel %vm159_vm0, %v161_v6, %v163_v10  ;;  %v165_v26 = vrot.slane %v55_v7, 1  ;;  %v1292_v27 = vsel %vm139_vm1, %v134_v17, %v140_v14  ;;  %v63_v34 = vld [vmem:[%s1613_s1 + $0x38] sm:$0xff]  ;;  %v64_v42 = vld [vmem:[%s1613_s1 + $0x40] sm:$0xff]  ;;  %v65_v43 = vld [vmem:[%s1613_s1 + $0x48] sm:$0xff]  ;;  %s1163_s28 = smov 104  }
   0x6   :  { %193 = vrot.lane.b32.xlu0 %v162_v15, %s1158_s0  ;;  %1060 = vmatpush1.bf16.msra.mxu0 %v1059_v16  ;;  %v92_v22 = vand.u32 15, %v78_v18  ;;  %v106_v29 = vand.u32 15, %v80_v19  ;;  %v1065_v31 = vpack.c.bf16 %v61_v25, %v60_v24  ;;  %v1302_v32 = vsel %vm139_vm1, %v140_v14, %v141_v20  ;;  %v66_v46 = vld [vmem:[%s1613_s1 + $0x50] sm:$0xff]  ;;  %v67_v47 = vld [vmem:[%s1613_s1 + $0x58] sm:$0xff]  ;;  %v68_v49 = vld [vmem:[%s1613_s1 + $0x60] sm:$0xff] }
   0x7   :  { %1061 = vmatprep.subr.bf16.mxu0 %v1156_v4  ;;  %v143_v35 = vrot.slane %v54_v3, 7  ;;  %v166_v36 = vsel %vm159_vm0, %v163_v10, %v165_v26  ;;  %v172_v38 = vsel %vm159_vm0, %v165_v26, %v160_v5  ;;  %v1068_v41 = vpack.c.bf16 %v63_v34, %v62_v33  ;;  %v69_v50 = vld [vmem:[%s1613_s1 + $0x68] sm:$0xff]  ;;  %v70_v52 = vld [vmem:[%s1613_s1 + $0x70] sm:$0xff]  ;;  %v71_v53 = vld [vmem:[%s1613_s1 + $0x78] sm:$0xff] }
   0x8   :  { %vm1294_vm2 = vcmp.ne.s32.totalorder %v92_v22, 15  ;;  %vm1313_vm3 = vcmp.ne.s32.totalorder %v106_v29, 15  ;;  %v1071_v45 = vpack.c.bf16 %v65_v43, %v64_v42  ;;  %v1074_v48 = vpack.c.bf16 %v67_v47, %v66_v46  ;;  %v72_v55 = vld [vmem:[%s1613_s1 + $0x80] sm:$0xff]  ;;  %v73_v56 = vld [vmem:[%s1613_s1 + $0x88] sm:$0xff]  ;;  %v339_v29 = vld [vmem:[%s1614_s4 + $0x30] sm:$0xff]  ;;  %s1164_s1 = smov 92  }
   0x9   :  { %v174_v30 = vsel %vm1294_vm2, %v164_v23, 0.0  ;;  %v144_v39 = vsel %vm139_vm1, %v141_v20, %v143_v35  ;;  %v1320_v40 = vsel %vm139_vm1, %v143_v35, %v134_v17  ;;  %v176_v44 = vsel %vm1313_vm3, %v172_v38, 0.0  ;;  %v333_v19 = vld [vmem:[%s1614_s4] sm:$0xff]  ;;  %v334_v20 = vld [vmem:[%s1614_s4 + $0x8] sm:$0xff]  ;;  %v336_v23 = vld [vmem:[%s1614_s4 + $0x18] sm:$0xff] }
   0xa   :  { %181 = vrot.lane.b32.xlu0 %v54_v3, %s1157_s24  ;;  %1063 = vmatpush1.bf16.msra.mxu0 %v1062_v21  ;;  %v1077_v51 = vpack.c.bf16 %v69_v50, %v68_v49  ;;  %v1080_v54 = vpack.c.bf16 %v71_v53, %v70_v52  ;;  %v1083_v57 = vpack.c.bf16 %v73_v56, %v72_v55  ;;  %v85_v58 = vand.u32 15, %v1268_v9  ;;  %v335_v21 = vld [vmem:[%s1614_s4 + $0x10] sm:$0xff]  ;;  %v337_v25 = vld [vmem:[%s1614_s4 + $0x20] sm:$0xff]  ;;  %v338_v26 = vld [vmem:[%s1614_s4 + $0x28] sm:$0xff] }
   0xb   :  { %195 = vrot.lane.b32.xlu1 %v174_v30, %s1158_s0  ;;  %1064 = vmatprep.subr.bf16.mxu0 %v1156_v4  ;;  %v79_v59 = vadd.s32 16, %v1268_v9  ;;  %v1086_v22 = vpack.c.bf16 %v334_v20, %v333_v19  ;;  %v1089_v24 = vpack.c.bf16 %v336_v23, %v335_v21  ;;  %v340_v30 = vld [vmem:[%s1614_s4 + $0x38] sm:$0xff]  ;;  %v342_v33 = vld [vmem:[%s1614_s4 + $0x48] sm:$0xff]  ;;  %v343_v35 = vld [vmem:[%s1614_s4 + $0x50] sm:$0xff]  ;;  %vm409_vm9 = vcmask 523264  }
   0xc   :  { %vm1366_vm4 = vcmp.ne.s32.totalorder %v85_v58, 0  ;;  %v347_v42 = vld [vmem:[%s1614_s4 + $0x70] sm:$0xff]  ;;  %v348_v43 = vld [vmem:[%s1614_s4 + $0x78] sm:$0xff]  ;;  %v350_v46 = vld [vmem:[%s1614_s4 + $0x88] sm:$0xff]  ;;  %vm535_vm10 = vcmask 519168   ;;  %vm543_vm11 = vcmask 523268  }
   0xd   :  { %v151_v62 = vsel %vm1366_vm4, %v1292_v27, 0.0  ;;  %v99_v63 = vand.u32 15, %v79_v59  ;;  %1087 = vmatpush1.bf16.msra.mxu1 %v1086_v22  ;;  %v1092_v27 = vpack.c.bf16 %v338_v26, %v337_v25  ;;  %v352_v49 = vld [vmem:[%s1614_s4 + $0x98] sm:$0xff]  ;;  %v354_v52 = vld [vmem:[%s1614_s4 + $0xa8] sm:$0xff]  ;;  %v999_v58 = vld [vmem:[%s1616_s3] ss:$0 sm:$0xff] }
   0xe   :  { %183 = vrot.lane.b32.xlu0 %v55_v7, %s1157_s24  ;;  %1066 = vmatpush1.bf16.msra.mxu0 %v1065_v31  ;;  %v1095_v31 = vpack.c.bf16 %v340_v30, %v339_v29  ;;  %v356_v55 = vld [vmem:[%s1614_s4 + $0xb8] sm:$0xff]  ;;  %v1005_v5 = vld [vmem:[%s1618_s6] ss:$0 sm:$0xff]  ;;  %vm594_vm12 = vcmask 1041408   ;;  %vm596_vm13 = vcmask 1042432   ;;  %vm598_vm14 = vcmask 1043456  }
   0xf   :  { %197 = vrot.lane.b32.xlu1 %v166_v36, %s1158_s0  ;;  %1067 = vmatprep.subr.bf16.mxu0 %v1156_v4  ;;  %vm1376_vm8 = vcmp.ne.s32.totalorder %v99_v63, 0  ;;  %v344_v36 = vld [vmem:[%s1614_s4 + $0x58] sm:$0xff]  ;;  %vm600_vm15 = vcmask 1044480   ;;  %s1161_s6 = smov 124  }
  0x10   :  { %v153_v6 = vsel %vm1376_vm8, %v144_v39, 0.0  ;;  %1088 = vmatprep.subr.bf16.mxu1 %v1156_v4  ;;  %v1101_v38 = vpack.c.bf16 %v344_v36, %v343_v35  ;;  %v345_v39 = vld [vmem:[%s1614_s4 + $0x60] sm:$0xff] }
  0x11   :  { %1090 = vmatpush1.bf16.msra.mxu1 %v1089_v24 }
  0x12   :  { %1069 = vmatpush1.bf16.msra.mxu0 %v1068_v41  ;;  %1091 = vmatprep.subr.bf16.mxu1 %v1156_v4 }
  0x13   :  { %199 = vrot.lane.b32.xlu1 %v176_v44, %s1158_s0  ;;  %1070 = vmatprep.subr.bf16.mxu0 %v1156_v4  ;;  %v1107_v44 = vpack.c.bf16 %v348_v43, %v347_v42 }
  0x15   :  { %1093 = vmatpush1.bf16.msra.mxu1 %v1092_v27 }
  0x16   :  { %1072 = vmatpush1.bf16.msra.mxu0 %v1071_v45  ;;  %1094 = vmatprep.subr.bf16.mxu1 %v1156_v4  ;;  %v349_v45 = vld [vmem:[%s1614_s4 + $0x80] sm:$0xff] }
  0x17   :  { %1073 = vmatprep.subr.bf16.mxu0 %v1156_v4  ;;  %v1110_v47 = vpack.c.bf16 %v350_v46, %v349_v45 }
  0x19   :  { %1096 = vmatpush1.bf16.msra.mxu1 %v1095_v31 }
  0x1a   :  { %1075 = vmatpush1.bf16.msra.mxu0 %v1074_v48  ;;  %1097 = vmatprep.subr.bf16.mxu1 %v1156_v4  ;;  %v351_v48 = vld [vmem:[%s1614_s4 + $0x90] sm:$0xff] }
  0x1b   :  { %1076 = vmatprep.subr.bf16.mxu0 %v1156_v4  ;;  %v1113_v50 = vpack.c.bf16 %v352_v49, %v351_v48 }
  0x1e   :  { %1078 = vmatpush1.bf16.msra.mxu0 %v1077_v51  ;;  %v353_v51 = vld [vmem:[%s1614_s4 + $0xa0] sm:$0xff] }
  0x1f   :  { %1079 = vmatprep.subr.bf16.mxu0 %v1156_v4  ;;  %v1116_v53 = vpack.c.bf16 %v354_v52, %v353_v51 }
  0x22   :  { %1081 = vmatpush1.bf16.msra.mxu0 %v1080_v54  ;;  %v355_v54 = vld [vmem:[%s1614_s4 + $0xb0] sm:$0xff] }
  0x23   :  { %1082 = vmatprep.subr.bf16.mxu0 %v1156_v4  ;;  %v1119_v56 = vpack.c.bf16 %v356_v55, %v355_v54 }
  0x26   :  { %1084 = vmatpush1.bf16.msra.mxu0 %v1083_v57  ;;  %v998_v57 = vld [vmem:[%s1615_s2] ss:$0 sm:$0xff] }
  0x27   :  { %1121 = vmatprep.subr.bf16.mxu0 %v1156_v4 }
  0x74   :  { %v178_v61 = vpop.permute.xlu0 %177  ;;  %v180_v0 = vpop.permute.xlu1 %179 }
  0x75   :  { %v206_v1 = vsel %vm205_vm5, %v151_v62, %v178_v61  ;;  %v207_v8 = vsel %vm205_vm5, %v1302_v32, %v180_v0  ;;  %v341_v32 = vld [vmem:[%s1614_s4 + $0x40] sm:$0xff] }
  0x76   :  { %v1098_v34 = vpack.c.bf16 %v342_v33, %v341_v32 }
  0x78   :  { %v194_v2 = vpop.permute.xlu0 %193  ;;  %1099 = vmatpush1.bf16.msra.mxu1 %v1098_v34 }
  0x79   :  { %994 = vmatprep.mubr.msk.f32.mxu0 %vm215_vm6, %v194_v2  ;;  %v211_v3 = vsel %vm210_vm7, %v206_v1, %v194_v2  ;;  %1100 = vmatprep.subr.bf16.mxu1 %v1156_v4 }
  0x7a   :  { %289 = vmatmul.mubr.f32.vlgmr.msra.gmra.mrb[0].mxu0 %v211_v3 }
  0x7c   :  { %v182_v7 = vpop.permute.xlu0 %181  ;;  %1102 = vmatpush1.bf16.msra.mxu1 %v1101_v38 }
  0x7d   :  { %v196_v10 = vpop.permute.xlu1 %195  ;;  %v208_v12 = vsel %vm205_vm5, %v153_v6, %v182_v7  ;;  %1103 = vmatprep.subr.bf16.mxu1 %v1156_v4 }
  0x7e   :  { %995 = vmatprep.mubr.msk.f32.mxu0 %vm215_vm6, %v196_v10  ;;  %v212_v11 = vsel %vm210_vm7, %v207_v8, %v196_v10 }
  0x7f   :  { %294 = vmatmul.mubr.f32.gmra.mrb[2].mxu0 %v212_v11 }
  0x80   :  { %v184_v13 = vpop.permute.xlu0 %183 }
  0x81   :  { %v198_v14 = vpop.permute.xlu1 %197  ;;  %v209_v16 = vsel %vm205_vm5, %v1320_v40, %v184_v13  ;;  %v346_v40 = vld [vmem:[%s1614_s4 + $0x68] sm:$0xff]  ;;  %s1159_s4 = smov 64  }
  0x82   :  { %996 = vmatprep.mubr.msk.f32.mxu0 %vm215_vm6, %v198_v14  ;;  %v213_v15 = vsel %vm210_vm7, %v208_v12, %v198_v14  ;;  %v1104_v41 = vpack.c.bf16 %v346_v40, %v345_v39 }
  0x83   :  { %299 = vmatmul.mubr.f32.gmra.mrb[4].mxu0 %v213_v15 }
  0x84   :  { %1105 = vmatpush1.bf16.msra.mxu1 %v1104_v41 }
  0x85   :  { %v200_v17 = vpop.permute.xlu1 %199  ;;  %1106 = vmatprep.subr.bf16.mxu1 %v1156_v4 }
  0x86   :  { %997 = vmatprep.mubr.msk.f32.mxu0 %vm215_vm6, %v200_v17  ;;  %v214_v18 = vsel %vm210_vm7, %v209_v16, %v200_v17  ;;  %vm632_vm7 = vcmask 97280  }
  0x87   :  { %304 = vmatmul.mubr.f32.gmra.mrb[6].mxu0 %v214_v18 }
  0x88   :  { %1108 = vmatpush1.bf16.msra.mxu1 %v1107_v44 }
  0x89   :  { %1109 = vmatprep.subr.bf16.mxu1 %v1156_v4 }
  0x8c   :  { %1111 = vmatpush1.bf16.msra.mxu1 %v1110_v47  ;;  %v1004_v47 = vld [vmem:[%s1617_s5] ss:$0 sm:$0xff]  ;;  %s1160_s5 = smov 120  }
  0x8d   :  { %1112 = vmatprep.subr.bf16.mxu1 %v1156_v4 }
  0x90   :  { %1114 = vmatpush1.bf16.msra.mxu1 %v1113_v50 }
  0x91   :  { %1115 = vmatprep.subr.bf16.mxu1 %v1156_v4 }
  0x94   :  { %1117 = vmatpush1.bf16.msra.mxu1 %v1116_v53 }
  0x95   :  { %1118 = vmatprep.subr.bf16.mxu1 %v1156_v4 }
  0x98   :  { %1120 = vmatpush1.bf16.msra.mxu1 %v1119_v56 }
 0x14d   :  { %v290_v59 = vpop.f32.mrb[0].mxu0 }
 0x14e   :  { %v315_v61 = vmul.f32 %v998_v57, %v290_v59  ;;  %v292_v62 = vpop.f32.mrb[1].mxu0 }
 0x150   :  { %v325_v63 = vadd.f32 %v999_v58, %v315_v61 }
 0x152   :  { %v329_v0 = vmax.f32 %v325_v63, 0.0  ;;  %v295_v1 = vpop.f32.mrb[2].mxu0 }
 0x153   :  { %v316_v2 = vmul.f32 %v998_v57, %v295_v1  ;;  %v297_v3 = vpop.f32.mrb[3].mxu0 }
 0x154   :  { %397 = vrot.lane.b32.xlu0 %v329_v0, %s1159_s4  ;;  %v365_v12 = vrot.slane %v329_v0, 7  ;;  %v380_v15 = vrot.slane %v329_v0, 1 }
 0x155   :  { %v326_v6 = vadd.f32 %v999_v58, %v316_v2 }
 0x156   :  { %v300_v7 = vpop.f32.mrb[4].mxu0 }
 0x157   :  { %v330_v8 = vmax.f32 %v326_v6, 0.0  ;;  %v317_v10 = vmul.f32 %v998_v57, %v300_v7  ;;  %v302_v11 = vpop.f32.mrb[5].mxu0 }
 0x159   :  { %v366_v13 = vrot.slane %v330_v8, 7  ;;  %v327_v14 = vadd.f32 %v999_v58, %v317_v10  ;;  %399 = vrot.lane.b32.xlu1 %v330_v8, %s1159_s4  ;;  %v381_v16 = vrot.slane %v330_v8, 1 }
 0x15a   :  { %v305_v17 = vpop.f32.mrb[6].mxu0 }
 0x15b   :  { %v331_v18 = vmax.f32 %v327_v14, 0.0  ;;  %v318_v19 = vmul.f32 %v998_v57, %v305_v17  ;;  %v307_v20 = vpop.f32.mrb[7].mxu0  ;;  %v382_v21 = vsel %vm159_vm0, %v380_v15, %v381_v16  ;;  %v367_v22 = vsel %vm139_vm1, %v365_v12, %v366_v13 }
 0x15c   :  { %1000 = vmatprep.mubr.msk.f32.mxu1 %vm409_vm9, %v382_v21 }
 0x15d   :  { %v368_v23 = vrot.slane %v331_v18, 7  ;;  %v383_v24 = vrot.slane %v331_v18, 1  ;;  %v328_v25 = vadd.f32 %v999_v58, %v318_v19  ;;  %401 = vrot.lane.b32.xlu0 %v331_v18, %s1159_s4 }
 0x15f   :  { %v332_v26 = vmax.f32 %v328_v25, 0.0  ;;  %v384_v27 = vsel %vm159_vm0, %v381_v16, %v383_v24  ;;  %v369_v29 = vsel %vm139_vm1, %v366_v13, %v368_v23 }
 0x160   :  { %v394_v40 = vsel %vm1294_vm2, %v384_v27, 0.0  ;;  %v378_v44 = vsel %vm1376_vm8, %v369_v29, 0.0  ;;  %vm602_vm2 = vcmask 1045504  }
 0x161   :  { %v360_v30 = vrot.slane %v332_v26, 7  ;;  %v385_v31 = vrot.slane %v332_v26, 1  ;;  %403 = vrot.lane.b32.xlu1 %v332_v26, %s1159_s4  ;;  %s1168_s4 = smov 32  }
 0x163   :  { %v375_v32 = vsel %vm139_vm1, %v360_v30, %v365_v12  ;;  %v386_v33 = vsel %vm159_vm0, %v383_v24, %v385_v31  ;;  %v392_v34 = vsel %vm159_vm0, %v385_v31, %v380_v15  ;;  %v370_v35 = vsel %vm139_vm1, %v368_v23, %v360_v30 }
 0x164   :  { %v376_v38 = vsel %vm1366_vm4, %v375_v32, 0.0  ;;  %v396_v45 = vsel %vm1313_vm3, %v392_v34, 0.0  ;;  %vm628_vm3 = vcmask 31744   ;;  %vm630_vm4 = vcmask 64512  }
 0x1c6   :  { %v398_v36 = vpop.permute.xlu0 %397 }
 0x1c7   :  { %v410_v39 = vsel %vm409_vm9, %v376_v38, %v398_v36 }
 0x1c8   :  { %491 = vmatmul.mubr.f32.vlgmr.msra.gmra.mrb[0].mxu1 %v410_v39 }
 0x1c9   :  { %1001 = vmatprep.mubr.msk.f32.mxu1 %vm409_vm9, %v394_v40 }
 0x1cb   :  { %v400_v41 = vpop.permute.xlu1 %399 }
 0x1cc   :  { %v411_v42 = vsel %vm409_vm9, %v367_v22, %v400_v41 }
 0x1cd   :  { %496 = vmatmul.mubr.f32.gmra.mrb[2].mxu1 %v411_v42 }
 0x1ce   :  { %1002 = vmatprep.mubr.msk.f32.mxu1 %vm409_vm9, %v386_v33 }
 0x1cf   :  { %v402_v43 = vpop.permute.xlu0 %401 }
 0x1d0   :  { %v412_v60 = vsel %vm409_vm9, %v378_v44, %v402_v43 }
 0x1d1   :  { %501 = vmatmul.mubr.f32.gmra.mrb[4].mxu1 %v412_v60 }
 0x1d2   :  { %1003 = vmatprep.mubr.msk.f32.mxu1 %vm409_vm9, %v396_v45 }
 0x1d3   :  { %v404_v28 = vpop.permute.xlu1 %403 }
 0x1d4   :  { %v413_v46 = vsel %vm409_vm9, %v370_v35, %v404_v28 }
 0x1d5   :  { %506 = vmatmul.mubr.f32.gmra.mrb[6].mxu1 %v413_v46 }
 0x29b   :  { %v492_v48 = vpop.f32.mrb[0].mxu1 }
 0x29c   :  { %v517_v49 = vmul.f32 %v1004_v47, %v492_v48  ;;  %v494_v50 = vpop.f32.mrb[1].mxu1 }
 0x29e   :  { %v527_v51 = vadd.f32 %v1005_v5, %v517_v49 }
 0x2a0   :  { %v531_v37 = vmax.f32 %v527_v51, 0.0  ;;  %v497_v52 = vpop.f32.mrb[2].mxu1 }
 0x2a1   :  { %v518_v53 = vmul.f32 %v1004_v47, %v497_v52  ;;  %v499_v54 = vpop.f32.mrb[3].mxu1 }
 0x2a2   :  { %v536_v55 = vsel %vm535_vm10, %v531_v37, -inf  ;;  %v544_v56 = vsel %vm543_vm11, %v531_v37, -inf }
 0x2a3   :  { %v537_v57 = vrot.slane %v536_v55, 4  ;;  %v545_v58 = vrot.slane %v544_v56, 4  ;;  %v528_v59 = vadd.f32 %v1005_v5, %v518_v53 }
 0x2a4   :  { %v502_v61 = vpop.f32.mrb[4].mxu1 }
 0x2a5   :  { %v538_v62 = vmax.f32 %v536_v55, %v537_v57  ;;  %v546_v63 = vmax.f32 %v544_v56, %v545_v58  ;;  %v532_v0 = vmax.f32 %v528_v59, 0.0  ;;  %v519_v1 = vmul.f32 %v1004_v47, %v502_v61  ;;  %v504_v2 = vpop.f32.mrb[5].mxu1 }
 0x2a7   :  { %v539_v3 = vrot.slane %v538_v62, 2  ;;  %v547_v6 = vrot.slane %v546_v63, 2  ;;  %v551_v7 = vsel %vm535_vm10, %v532_v0, -inf  ;;  %v558_v8 = vsel %vm543_vm11, %v532_v0, -inf }
 0x2a8   :  { %v552_v10 = vrot.slane %v551_v7, 4  ;;  %v559_v11 = vrot.slane %v558_v8, 4  ;;  %v529_v12 = vadd.f32 %v1005_v5, %v519_v1  ;;  %v507_v13 = vpop.f32.mrb[6].mxu1 }
 0x2a9   :  { %v540_v14 = vmax.f32 %v538_v62, %v539_v3  ;;  %v548_v15 = vmax.f32 %v546_v63, %v547_v6  ;;  %v520_v16 = vmul.f32 %v1004_v47, %v507_v13  ;;  %v509_v17 = vpop.f32.mrb[7].mxu1  ;;  %v635_v13 = vld [vmem:[%s1619_s7 + $0x8] sm:$0xff] }
 0x2aa   :  { %v553_v18 = vmax.f32 %v551_v7, %v552_v10  ;;  %v560_v19 = vmax.f32 %v558_v8, %v559_v11  ;;  %v533_v20 = vmax.f32 %v529_v12, 0.0  ;;  %v634_v12 = vld [vmem:[%s1619_s7] sm:$0xff]  ;;  %v637_v17 = vld [vmem:[%s1619_s7 + $0x18] sm:$0xff] }
 0x2ab   :  { %v541_v21 = vrot.slane %v540_v14, 1  ;;  %v549_v22 = vrot.slane %v548_v15, 1  ;;  %v530_v23 = vadd.f32 %v1005_v5, %v520_v16  ;;  %v1122_v16 = vpack.c.bf16 %v635_v13, %v634_v12 }
 0x2ac   :  { %v554_v24 = vrot.slane %v553_v18, 2  ;;  %v561_v25 = vrot.slane %v560_v19, 2  ;;  %v565_v26 = vsel %vm535_vm10, %v533_v20, -inf  ;;  %v572_v27 = vsel %vm543_vm11, %v533_v20, -inf  ;;  %v638_v20 = vld [vmem:[%s1619_s7 + $0x20] sm:$0xff] }
 0x2ad   :  { %v542_v29 = vmax.f32 %v540_v14, %v541_v21  ;;  %v566_v30 = vrot.slane %v565_v26, 4  ;;  %v573_v31 = vrot.slane %v572_v27, 4  ;;  %v550_v32 = vmax.f32 %v548_v15, %v549_v22  ;;  %v636_v14 = vld [vmem:[%s1619_s7 + $0x10] sm:$0xff]  ;;  %1123 = vmatpush3.bf16.msra.mxu0 %v1122_v16  ;;  %v639_v21 = vld [vmem:[%s1619_s7 + $0x28] sm:$0xff]  ;;  %s1167_s7 = smov 16  }
 0x2ae   :  { %v555_v33 = vmax.f32 %v553_v18, %v554_v24  ;;  %v562_v34 = vmax.f32 %v560_v19, %v561_v25  ;;  %v534_v35 = vmax.f32 %v530_v23, 0.0  ;;  %v1125_v19 = vpack.c.bf16 %v637_v17, %v636_v14  ;;  %1124 = vmatprep.subr.bf16.mxu0 %v1156_v4  ;;  %v809_v16 = vld [vmem:[%s1622_s10 + $0x8] sm:$0xff]  ;;  %v810_v17 = vld [vmem:[%s1622_s10 + $0x10] sm:$0xff] }
 0x2af   :  { %v567_v36 = vmax.f32 %v565_v26, %v566_v30  ;;  %v574_v38 = vmax.f32 %v572_v27, %v573_v31  ;;  %v593_v28 = vsel %vm139_vm1, %v542_v29, %v550_v32  ;;  %v1128_v22 = vpack.c.bf16 %v639_v21, %v638_v20 }
 0x2b0   :  { %v556_v39 = vrot.slane %v555_v33, 1  ;;  %v563_v40 = vrot.slane %v562_v34, 1  ;;  %v579_v41 = vsel %vm535_vm10, %v534_v35, -inf  ;;  %v586_v42 = vsel %vm543_vm11, %v534_v35, -inf }
 0x2b1   :  { %v568_v43 = vrot.slane %v567_v36, 2  ;;  %v575_v44 = vrot.slane %v574_v38, 2  ;;  %v580_v60 = vrot.slane %v579_v41, 4  ;;  %v587_v45 = vrot.slane %v586_v42, 4  ;;  %1126 = vmatpush3.bf16.msra.mxu0 %v1125_v19  ;;  %v811_v19 = vld [vmem:[%s1622_s10 + $0x18] sm:$0xff] }
 0x2b2   :  { %v557_v46 = vmax.f32 %v555_v33, %v556_v39  ;;  %v564_v47 = vmax.f32 %v562_v34, %v563_v40  ;;  %1127 = vmatprep.subr.bf16.mxu0 %v1156_v4  ;;  %v1166_v23 = vmov 0.0   ;;  %v646_v27 = vand.u32 3, %v1268_v9 }
 0x2b3   :  { %v569_v5 = vmax.f32 %v567_v36, %v568_v43  ;;  %v576_v48 = vmax.f32 %v574_v38, %v575_v44  ;;  %v581_v49 = vmax.f32 %v579_v41, %v580_v60  ;;  %v588_v50 = vmax.f32 %v586_v42, %v587_v45  ;;  %v1007_v41 = vld [vmem:[%s1620_s8] ss:$0 sm:$0xff] }
 0x2b4   :  { %v595_v51 = vsel %vm594_vm12, %v593_v28, %v557_v46  ;;  %vm660_vm8 = vcmp.ne.s32.totalorder %v646_v27, 3  ;;  %vm654_vm9 = vcmp.ne.s32.totalorder %v646_v27, 0  ;;  %vm673_vm10 = vcmask 261120   ;;  %v1008_v42 = vld [vmem:[%s1621_s9] ss:$0 sm:$0xff] }
 0x2b5   :  { %v570_v37 = vrot.slane %v569_v5, 1  ;;  %v577_v52 = vrot.slane %v576_v48, 1  ;;  %v582_v53 = vrot.slane %v581_v49, 2  ;;  %v589_v54 = vrot.slane %v588_v50, 2  ;;  %1129 = vmatpush3.bf16.msra.mxu0 %v1128_v22 }
 0x2b6   :  { %v597_v55 = vsel %vm596_vm13, %v595_v51, %v564_v47  ;;  %1130 = vmatprep.subr.bf16.mxu0 %v1156_v4  ;;  %vm763_vm11 = vcmask 254976   ;;  %v1134_v20 = vpack.c.bf16 %v811_v19, %v810_v17 }
 0x2b7   :  { %v571_v56 = vmax.f32 %v569_v5, %v570_v37  ;;  %v578_v57 = vmax.f32 %v576_v48, %v577_v52  ;;  %v583_v58 = vmax.f32 %v581_v49, %v582_v53  ;;  %v590_v59 = vmax.f32 %v588_v50, %v589_v54 }
 0x2b9   :  { %v584_v61 = vrot.slane %v583_v58, 1  ;;  %v591_v62 = vrot.slane %v590_v59, 1  ;;  %v599_v63 = vsel %vm598_vm14, %v597_v55, %v571_v56  ;;  %vm771_vm14 = vcmask 257026  }
 0x2ba   :  { %v601_v0 = vsel %vm600_vm15, %v599_v63, %v578_v57  ;;  %vm779_vm15 = vcmask 259076  }
 0x2bb   :  { %v585_v1 = vmax.f32 %v583_v58, %v584_v61  ;;  %v592_v2 = vmax.f32 %v590_v59, %v591_v62 }
 0x2bd   :  { %v603_v3 = vsel %vm602_vm2, %v601_v0, %v585_v1  ;;  %vm787_vm2 = vcmask 261126  }
 0x2be   :  { %v604_v6 = vsel %vm159_vm0, %v603_v3, %v592_v2  ;;  %vm1165_vm0 = vmmov 0  }
 0x2bf   :  { %610 = vrot.lane.b32.xlu1 %v604_v6, %s1160_s5  ;;  %606 = vrot.lane.b32.xlu0 %v604_v6, %s1161_s6 }
 0x2c0   :  { %1040 = vmatprep.mubr.msk.f32.mxu0 %vm1165_vm0, %v1166_v23 }
 0x2c3   :  { %614 = vrot.lane.b32.xlu0 %v604_v6, %s1162_s19 }
 0x331   :  { %v607_v7 = vpop.permute.xlu0 %606  ;;  %v611_v10 = vpop.permute.xlu1 %610 }
 0x332   :  { %v609_v8 = vmax.f32 %v604_v6, %v607_v7 }
 0x334   :  { %v613_v11 = vmax.f32 %v609_v8, %v611_v10 }
 0x335   :  { %v615_v15 = vpop.permute.xlu0 %614 }
 0x336   :  { %v617_v18 = vmax.f32 %v613_v11, %v615_v15  ;;  %v808_v15 = vld [vmem:[%s1622_s10] sm:$0xff] }
 0x338   :  { %622 = vrot.lane.b32.xlu0 %v617_v18, %s1163_s28  ;;  %619 = vrot.lane.b32.xlu1 %v617_v18, %s1162_s19 }
 0x33c   :  { %625 = vrot.lane.b32.xlu1 %v617_v18, %s1164_s1 }
 0x3aa   :  { %v620_v24 = vpop.permute.xlu1 %619  ;;  %v623_v25 = vpop.permute.xlu0 %622 }
 0x3ab   :  { %v629_v26 = vsel %vm628_vm3, %v617_v18, %v620_v24  ;;  %v1131_v18 = vpack.c.bf16 %v809_v16, %v808_v15  ;;  %v813_v24 = vld [vmem:[%s1622_s10 + $0x28] sm:$0xff]  ;;  %vm948_vm3 = vcmask 125954  }
 0x3ac   :  { %v631_v30 = vsel %vm630_vm4, %v629_v26, %v623_v25  ;;  %v820_v26 = vand.u32 1, %v1268_v9 }
 0x3ae   :  { %v626_v29 = vpop.permute.xlu1 %625 }
 0x3af   :  { %v633_v31 = vsel %vm632_vm7, %v631_v30, %v626_v29 }
 0x3b0   :  { %665 = vrot.lane.b32.xlu0 %v633_v31, %s1167_s7  ;;  %v656_v32 = vrot.slane %v633_v31, 7  ;;  %v661_v33 = vrot.slane %v633_v31, 1 }
 0x3b2   :  { %v664_v34 = vsel %vm660_vm8, %v661_v33, 0.0  ;;  %v659_v35 = vsel %vm654_vm9, %v656_v32, 0.0 }
 0x3b3   :  { %669 = vrot.lane.b32.xlu1 %v664_v34, %s1168_s4 }
 0x422   :  { %v666_v36 = vpop.permute.xlu0 %665 }
 0x423   :  { %v672_v38 = vsel %vm215_vm6, %v659_v35, %v666_v36 }
 0x425   :  { %v670_v39 = vpop.permute.xlu1 %669 }
 0x426   :  { %v674_v40 = vsel %vm673_vm10, %v672_v38, %v670_v39 }
 0x427   :  { %1041 = vmatmul.mubr.msk.f32.vlgmr.msra.gmra.mrb[8].mxu0 %vm205_vm5, %v674_v40 }
 0x428   :  { %1055 = vmatprep.mubr.msk.f32.mxu0 %vm1165_vm0, %v1166_v23  ;;  %1132 = vmatpush3.bf16.msra.mxu0 %v1131_v18  ;;  %v812_v23 = vld [vmem:[%s1622_s10 + $0x20] sm:$0xff]  ;;  %vm828_vm0 = vcmp.ne.s32.totalorder %v820_v26, 0 }
 0x429   :  { %1133 = vmatprep.subr.bf16.mxu0 %v1156_v4  ;;  %v1137_v25 = vpack.c.bf16 %v813_v24, %v812_v23 }
 0x42c   :  { %1135 = vmatpush3.bf16.msra.mxu0 %v1134_v20 }
 0x42d   :  { %1136 = vmatprep.subr.bf16.mxu0 %v1156_v4 }
 0x430   :  { %1138 = vmatpush3.bf16.msra.mxu0 %v1137_v25 }
 0x4fa   :  { %v744_v43 = vpop.f32.mrb[8].mxu0 }
 0x4fb   :  { %v754_v44 = vmul.f32 %v1007_v41, %v744_v43  ;;  %v1042_v60 = vpop.f32.mrb[9].mxu0  ;;  %v1010_v41 = vld [vmem:[%s1623_s11] ss:$0 sm:$0xff] }
 0x4fd   :  { %v761_v45 = vadd.f32 %v1008_v42, %v754_v44  ;;  %v1011_v42 = vld [vmem:[%s1624_s12] ss:$0 sm:$0xff] }
 0x4ff   :  { %v762_v28 = vmax.f32 %v761_v45, 0.0 }
 0x501   :  { %v764_v46 = vsel %vm763_vm11, %v762_v28, -inf  ;;  %v772_v47 = vsel %vm771_vm14, %v762_v28, -inf  ;;  %v780_v5 = vsel %vm779_vm15, %v762_v28, -inf  ;;  %v788_v48 = vsel %vm787_vm2, %v762_v28, -inf }
 0x502   :  { %v765_v49 = vrot.slane %v764_v46, 4  ;;  %v773_v50 = vrot.slane %v772_v47, 4  ;;  %v781_v51 = vrot.slane %v780_v5, 4  ;;  %v789_v37 = vrot.slane %v788_v48, 4 }
 0x504   :  { %v766_v52 = vmax.f32 %v764_v46, %v765_v49  ;;  %v774_v53 = vmax.f32 %v772_v47, %v773_v50  ;;  %v782_v54 = vmax.f32 %v780_v5, %v781_v51  ;;  %v790_v55 = vmax.f32 %v788_v48, %v789_v37 }
 0x506   :  { %v767_v56 = vrot.slane %v766_v52, 2  ;;  %v775_v57 = vrot.slane %v774_v53, 2  ;;  %v783_v58 = vrot.slane %v782_v54, 2  ;;  %v791_v59 = vrot.slane %v790_v55, 2 }
 0x508   :  { %v768_v61 = vmax.f32 %v766_v52, %v767_v56  ;;  %v776_v62 = vmax.f32 %v774_v53, %v775_v57  ;;  %v784_v63 = vmax.f32 %v782_v54, %v783_v58  ;;  %v792_v0 = vmax.f32 %v790_v55, %v791_v59 }
 0x509   :  { %v20_v54 = vstv %s1625_s14 }
 0x50a   :  { %v769_v1 = vrot.slane %v768_v61, 1  ;;  %v777_v2 = vrot.slane %v776_v62, 1  ;;  %v785_v3 = vrot.slane %v784_v63, 1  ;;  %v793_v6 = vrot.slane %v792_v0, 1  ;;  %21 = vst [vmem:[#allocation2] sm:$0x1] %v20_v54 }
 0x50c   :  { %v770_v7 = vmax.f32 %v768_v61, %v769_v1  ;;  %v778_v8 = vmax.f32 %v776_v62, %v777_v2  ;;  %v786_v10 = vmax.f32 %v784_v63, %v785_v3  ;;  %v794_v11 = vmax.f32 %v792_v0, %v793_v6  ;;  %v1012_v62 = vld [vmem:[%s1626_s13] ss:$0 sm:$0xff] }
 0x50e   :  { %v795_v12 = vsel %vm139_vm1, %v770_v7, %v778_v8 }
 0x50f   :  { %v796_v13 = vsel %vm594_vm12, %v795_v12, %v786_v10  ;;  %vm836_vm12 = vcmp.ne.s32.totalorder %v820_v26, 1 }
 0x510   :  { %v797_v14 = vsel %vm596_vm13, %v796_v13, %v794_v11 }
 0x511   :  { %799 = vrot.lane.b32.xlu0 %v797_v14, %s1160_s5  ;;  %v1013_v2 = vld [vmem:[#allocation2] ss:$0 sm:$0xff] }
 0x583   :  { %v800_v21 = vpop.permute.xlu0 %799 }
 0x584   :  { %v802_v22 = vmax.f32 %v797_v14, %v800_v21 }
 0x586   :  { %804 = vrot.lane.b32.xlu1 %v802_v22, %s1160_s5 }
 0x5f8   :  { %v805_v27 = vpop.permute.xlu1 %804 }
 0x5f9   :  { %v807_v29 = vsel %vm630_vm4, %v802_v22, %v805_v27 }
 0x5fa   :  { %v830_v30 = vrot.slane %v807_v29, 3  ;;  %v832_v31 = vrot.slane %v807_v29, 7  ;;  %843 = vrot.lane.b32.xlu0 %v807_v29, %s1167_s7  ;;  %v837_v4 = vrot.slane %v807_v29, 1  ;;  %v839_v32 = vrot.slane %v807_v29, 5 }
 0x5fc   :  { %v841_v33 = vsel %vm596_vm13, %v837_v4, %v839_v32  ;;  %v834_v34 = vsel %vm139_vm1, %v830_v30, %v832_v31  ;;  %vm940_vm13 = vcmask 123904  }
 0x5fd   :  { %v842_v35 = vsel %vm836_vm12, %v841_v33, 0.0  ;;  %v835_v36 = vsel %vm828_vm0, %v834_v34, 0.0 }
 0x5fe   :  { %847 = vrot.lane.b32.xlu1 %v842_v35, %s1168_s4 }
 0x66c   :  { %v844_v9 = vpop.permute.xlu0 %843 }
 0x66d   :  { %v850_v38 = vsel %vm215_vm6, %v835_v36, %v844_v9 }
 0x670   :  { %v848_v39 = vpop.permute.xlu1 %847 }
 0x671   :  { %v851_v40 = vsel %vm673_vm10, %v850_v38, %v848_v39 }
 0x672   :  { %1056 = vmatmul.mubr.msk.f32.vlgmr.msra.gmra.mrb[10].mxu0 %vm205_vm5, %v851_v40  ;;  %vm970_vm5 = vcmask 58368  }
 0x745   :  { %v921_v43 = vpop.f32.mrb[10].mxu0 }
 0x746   :  { %v931_v44 = vmul.f32 %v1010_v41, %v921_v43  ;;  %v1057_v60 = vpop.f32.mrb[11].mxu0 }
 0x748   :  { %v938_v45 = vadd.f32 %v1011_v42, %v931_v44 }
 0x74a   :  { %v939_v28 = vmax.f32 %v938_v45, 0.0 }
 0x74c   :  { %v941_v46 = vsel %vm940_vm13, %v939_v28, -inf  ;;  %v949_v47 = vsel %vm948_vm3, %v939_v28, -inf }
 0x74d   :  { %v942_v5 = vrot.slane %v941_v46, 4  ;;  %v950_v48 = vrot.slane %v949_v47, 4 }
 0x74f   :  { %v943_v49 = vmax.f32 %v941_v46, %v942_v5  ;;  %v951_v50 = vmax.f32 %v949_v47, %v950_v48 }
 0x751   :  { %v944_v51 = vrot.slane %v943_v49, 2  ;;  %v952_v37 = vrot.slane %v951_v50, 2 }
 0x753   :  { %v945_v52 = vmax.f32 %v943_v49, %v944_v51  ;;  %v953_v53 = vmax.f32 %v951_v50, %v952_v37 }
 0x755   :  { %v946_v55 = vrot.slane %v945_v52, 1  ;;  %v954_v56 = vrot.slane %v953_v53, 1 }
 0x757   :  { %v947_v57 = vmax.f32 %v945_v52, %v946_v55  ;;  %v955_v58 = vmax.f32 %v953_v53, %v954_v56 }
 0x759   :  { %v956_v59 = vsel %vm139_vm1, %v947_v57, %v955_v58  ;;  %vm988_vm1 = vcmask 1024  }
 0x75a   :  { %958 = vrot.lane.b32.xlu0 %v956_v59, %s1160_s5 }
 0x7cc   :  { %v959_v61 = vpop.permute.xlu0 %958 }
 0x7cd   :  { %v961_v63 = vmax.f32 %v956_v59, %v959_v61 }
 0x7cf   :  { %v969_v0 = vmul.f32 %v1012_v62, %v961_v63 }
 0x7d1   :  { %v971_v1 = vsel %vm970_vm5, %v969_v0, 0.0 }
 0x7d2   :  { %972 = vadd.xlane.f32.xlu1 %v971_v1 }
 0x85f   :  { %v973_v3 = vpop.xlane.xlu1 %972 }
 0x860   :  { %v981_v6 = vadd.f32 %v1013_v2, %v973_v3 }
 0x862   :  { %v982_v7 = vsub.f32 0.0, %v981_v6 }
 0x864   :  { %v983_v8 = vmul.f32 1.442695, %v982_v7 }
 0x866   :  { %1152 = vpow2.f32 %v983_v8 }
 0x870   :  { %v1153_v10 = vpop.eup %1152 }
 0x871   :  { %v985_v11 = vadd.f32 1.0, %v1153_v10 }
 0x873   :  { %1154 = vrcp.f32 %v985_v11 }
 0x87d   :  { %v1155_v12 = vpop.eup %1154 }
 0x87e   :  { %989 = vst.msk [vmem:[%s1627_s15] sm:$0x3] %vm988_vm1, %v1155_v12 }

</bundles_post_ra>
